<compile_context>
chip_gen: v5e
topology: v5e:2x2
jax: 0.10.0
libtpu: 0.0.40
codegen_flags: <defaults>
</compile_context>

<pallas_src>
import math
import functools

import jax
import jax.numpy as jnp
from jax.experimental import pallas as pl
from jax.experimental.pallas import tpu as pltpu


def encoder_layer_kernel(x_tile_ref, x_full_ref,
                         wq_ref, bq_ref, wkv_ref, bkv_ref,
                         wo_ref, w1_ref, b1_ref, w2_ref, vecs_ref,
                         *rest,
                         n_heads: int, eps: float, compute_dtype, return_attn: bool):
    if return_attn:
        out_ref, attn_ref, k_sc, v_sc = rest
    else:
        out_ref, k_sc, v_sc = rest
        attn_ref = None

    f32 = jnp.float32
    cdt = compute_dtype
    TL, D = x_tile_ref.shape
    dh = D // n_heads
    qi = pl.program_id(1)

    # --- K/V for the whole sequence: computed once per batch element (q-tile 0),
    #     kept resident in VMEM scratch across query tiles. --------------------
    @pl.when(qi == 0)
    def _():
        xf = x_full_ref[...]                                                 # (L, D) cdt
        kv = jnp.dot(xf, wkv_ref[...], preferred_element_type=f32) + bkv_ref[...]
        k_sc[...] = kv[:, :D].astype(cdt)
        v_sc[...] = kv[:, D:].astype(cdt)

    # --- Q projection for this query tile ------------------------------------
    x = x_tile_ref[...]                                                      # (TL, D) f32
    q = jnp.dot(x.astype(cdt), wq_ref[...], preferred_element_type=f32) + bq_ref[...]

    k = k_sc[...]                                                            # (L, D) cdt
    v = v_sc[...]
    scale = 1.0 / math.sqrt(dh)
    use_approx = cdt != jnp.float32

    # --- multi-head attention; per-head context gathered, single output matmul
    ctx_parts = []
    for h in range(n_heads):                        # static loop, small head count
        sl = slice(h * dh, (h + 1) * dh)
        qh = q[:, sl].astype(cdt)                                            # (TL, dh)
        kh = k[:, sl]                                                        # (L, dh)
        vh = v[:, sl]
        # contract dh directly; no kh.T materialization
        s = jax.lax.dot_general(qh, kh, (((1,), (1,)), ((), ())),
                                preferred_element_type=f32) * scale          # (TL, L)
        s = s - jnp.max(s, axis=-1, keepdims=True)
        e = jnp.exp(s)                                                       # f32 EUP
        denom = jnp.sum(e, axis=-1, keepdims=True)

        p_exact = None
        if return_attn or not use_approx:
            p_exact = e / denom                      # exact: stored rows sum to 1
        if return_attn:
            attn_ref[h] = p_exact.astype(attn_ref.dtype)
        if use_approx:
            p_ctx = e * pl.reciprocal(denom, approx=True)                    # EUP slot
        else:
            p_ctx = p_exact
        ctx_parts.append(
            jnp.dot(p_ctx.astype(cdt), vh, preferred_element_type=f32).astype(cdt))

    ctx = jnp.concatenate(ctx_parts, axis=-1)                                # (TL, D) cdt

    bo, g1, be1 = vecs_ref[0:1, :], vecs_ref[1:2, :], vecs_ref[2:3, :]
    b2, g2, be2 = vecs_ref[3:4, :], vecs_ref[4:5, :], vecs_ref[5:6, :]
    # single K=D output projection (full MXU fill)
    new_x = jnp.dot(ctx, wo_ref[...], preferred_element_type=f32) + bo

    # --- x = norm1(x + dropout(new_x)); dropout == identity at inference -----
    x1 = x + new_x
    mu = jnp.mean(x1, axis=-1, keepdims=True)
    var = jnp.mean((x1 - mu) ** 2, axis=-1, keepdims=True)
    x1 = (x1 - mu) * jax.lax.rsqrt(var + eps) * g1 + be1

    # --- FFN: conv1 (D->d_ff, k=1) -> relu -> conv2 (d_ff->D, k=1) ------------
    y = jnp.dot(x1.astype(cdt), w1_ref[...], preferred_element_type=f32) + b1_ref[...]
    y = jnp.maximum(y, 0.0)
    y = jnp.dot(y.astype(cdt), w2_ref[...], preferred_element_type=f32) + b2

    # --- out = norm2(x + y) ---------------------------------------------------
    z = x1 + y
    mu2 = jnp.mean(z, axis=-1, keepdims=True)
    var2 = jnp.mean((z - mu2) ** 2, axis=-1, keepdims=True)
    out_ref[...] = ((z - mu2) * jax.lax.rsqrt(var2 + eps) * g2 + be2).astype(out_ref.dtype)


def encoder_layer(x, params, *, n_heads, compute_dtype=jnp.float32,
                  return_attn=True, attn_dtype=None, q_tile=128, eps=1e-5):
    """x: (B, L, D) float32.  Returns (out (B,L,D), attn (B,H,L,L)|None, None, None)."""
    B, L, D = x.shape
    assert D % n_heads == 0
    TL = min(q_tile, L)
    assert L % TL == 0, "sequence length must be a multiple of the query tile"
    nq = L // TL
    d_ff = params["w1"].shape[1]
    H = n_heads
    cdt = compute_dtype
    attn_dtype = attn_dtype or jnp.float32

    # Pack weights / small vectors (fewer constant VMEM blocks); cast MXU operands.
    wq = params["wq"].astype(cdt)
    wkv = jnp.concatenate([params["wk"], params["wv"]], axis=1).astype(cdt)   # (D, 2D)
    wo = params["wo"].astype(cdt)
    w1 = params["w1"].astype(cdt)
    w2 = params["w2"].astype(cdt)
    bq = params["bq"].astype(jnp.float32)                                     # (1, D)
    bkv = jnp.concatenate([params["bk"], params["bv"]], axis=1).astype(jnp.float32)
    b1 = params["b1"].astype(jnp.float32)                                     # (1, d_ff)
    vecs = jnp.concatenate([params["bo"], params["g1"], params["be1"],
                            params["b2"], params["g2"], params["be2"]],
                           axis=0).astype(jnp.float32)                        # (6, D)
    # K/V source passed pre-cast to the compute dtype (halves its block in bf16).
    x_kv = x.astype(cdt)

    # --- derive the VMEM limit from the actual resident set -------------------
    isz = lambda dt: jnp.dtype(dt).itemsize
    est = (2 * TL * D * 4                                    # x query tile (2 bufs)
           + 2 * L * D * isz(cdt)                            # x_full K/V source (2 bufs)
           + 2 * TL * D * 4                                  # output tile (2 bufs)
           + (2 * D * D + D * d_ff + d_ff * D + D * D) * isz(cdt)   # weights (1 buf)
           + (D + 2 * D + d_ff + 6 * D) * 4                  # biases / LN vectors
           + 2 * L * D * isz(cdt))                           # K/V scratch
    if return_attn:
        est += 2 * H * TL * L * isz(attn_dtype)              # attn tile (2 bufs)
    vmem_limit = max(32 << 20, min(int(est * 1.3) + (4 << 20), 96 << 20))

    def build_and_call(weight_buffers):
        pm = None
        if weight_buffers is not None and hasattr(pl, "Buffered"):
            pm = pl.Buffered(weight_buffers)

        def const(a):
            if pm is not None:
                return pl.BlockSpec(a.shape, lambda b, q: (0,) * a.ndim,
                                    pipeline_mode=pm)
            return pl.BlockSpec(a.shape, lambda b, q: (0,) * a.ndim)

        in_specs = [
            pl.BlockSpec((None, TL, D), lambda b, q: (b, q, 0)),   # x query tile
            pl.BlockSpec((None, L, D), lambda b, q: (b, 0, 0)),    # full x (K/V source)
            const(wq), const(bq), const(wkv), const(bkv),
            const(wo), const(w1), const(b1), const(w2), const(vecs),
        ]
        out_specs = [pl.BlockSpec((None, TL, D), lambda b, q: (b, q, 0))]
        out_shape = [jax.ShapeDtypeStruct((B, L, D), x.dtype)]
        if return_attn:
            out_specs.append(pl.BlockSpec((None, H, TL, L), lambda b, q: (b, 0, q, 0)))
            out_shape.append(jax.ShapeDtypeStruct((B, H, L, L), attn_dtype))
        scratch_shapes = [pltpu.VMEM((L, D), cdt),   # K
                          pltpu.VMEM((L, D), cdt)]   # V

        return pl.pallas_call(
            functools.partial(encoder_layer_kernel, n_heads=n_heads, eps=eps,
                              compute_dtype=cdt, return_attn=return_attn),
            grid=(B, nq),
            in_specs=in_specs,
            out_specs=out_specs,
            out_shape=out_shape,
            scratch_shapes=scratch_shapes,
            compiler_params=pltpu.CompilerParams(
                dimension_semantics=("parallel", "arbitrary"),
                vmem_limit_bytes=vmem_limit),
        )(x, x_kv, wq, bq, wkv, bkv, wo, w1, b1, w2, vecs)

    try:
        results = build_and_call(1)      # single-buffered constant weights (saves VMEM)
    except Exception:                    # fallback for JAX builds without Buffered(1)
        results = build_and_call(None)

    if return_attn:
        out, attn = results
        return out, attn, None, None
    out = results[0] if isinstance(results, (list, tuple)) else results
    return out, None, None, None


def reference(x, params, *, n_heads, eps=1e-5):
    """Pure-JAX reference of the same forward pass (for correctness checks)."""
    B, L, D = x.shape
    dh = D // n_heads
    q = x @ params["wq"] + params["bq"][0]
    k = x @ params["wk"] + params["bk"][0]
    v = x @ params["wv"] + params["bv"][0]
    q = q.reshape(B, L, n_heads, dh).transpose(0, 2, 1, 3)
    k = k.reshape(B, L, n_heads, dh).transpose(0, 2, 1, 3)
    v = v.reshape(B, L, n_heads, dh).transpose(0, 2, 1, 3)
    s = jnp.einsum("bhld,bhmd->bhlm", q, k) / math.sqrt(dh)
    p = jax.nn.softmax(s, axis=-1)
    ctx = jnp.einsum("bhlm,bhmd->bhld", p, v).transpose(0, 2, 1, 3).reshape(B, L, D)
    new_x = ctx @ params["wo"] + params["bo"][0]

    def ln(z, g, b):
        mu = jnp.mean(z, -1, keepdims=True)
        var = jnp.mean((z - mu) ** 2, -1, keepdims=True)
        return (z - mu) * jax.lax.rsqrt(var + eps) * g[0] + b[0]

    x1 = ln(x + new_x, params["g1"], params["be1"])
    y = jnp.maximum(x1 @ params["w1"] + params["b1"][0], 0.0)
    y = y @ params["w2"] + params["b2"][0]
    return ln(x1 + y, params["g2"], params["be2"]), p


if __name__ == "__main__":
    B, L, D, H = 2, 8, 32, 4
    d_ff = 4 * D                       # d_ff = d_ff or 4 * d_model

    key = jax.random.PRNGKey(0)
    keys = jax.random.split(key, 12)
    sc = 0.1
    params = {
        "wq": sc * jax.random.normal(keys[0], (D, D), jnp.float32),
        "wk": sc * jax.random.normal(keys[1], (D, D), jnp.float32),
        "wv": sc * jax.random.normal(keys[2], (D, D), jnp.float32),
        "wo": sc * jax.random.normal(keys[3], (D, D), jnp.float32),
        "bq": sc * jax.random.normal(keys[4], (1, D), jnp.float32),
        "bk": sc * jax.random.normal(keys[5], (1, D), jnp.float32),
        "bv": sc * jax.random.normal(keys[6], (1, D), jnp.float32),
        "bo": sc * jax.random.normal(keys[7], (1, D), jnp.float32),
        "g1": jnp.ones((1, D), jnp.float32),
        "be1": jnp.zeros((1, D), jnp.float32),
        "w1": sc * jax.random.normal(keys[8], (D, d_ff), jnp.float32),   # conv1 (k=1)
        "b1": sc * jax.random.normal(keys[9], (1, d_ff), jnp.float32),
        "w2": sc * jax.random.normal(keys[10], (d_ff, D), jnp.float32),  # conv2 (k=1)
        "b2": sc * jax.random.normal(keys[11], (1, D), jnp.float32),
        "g2": jnp.ones((1, D), jnp.float32),
        "be2": jnp.zeros((1, D), jnp.float32),
    }

    x = jax.random.normal(jax.random.PRNGKey(1), (B, L, D), jnp.float32)
    ref_out, ref_attn = reference(x, params, n_heads=H)

    # 1) f32 config: tight correctness check vs the pure-JAX reference.
    out, attn, mask, sigma = encoder_layer(x, params, n_heads=H)
    out = jax.block_until_ready(out)
    attn = jax.block_until_ready(attn)
    assert jnp.allclose(out, ref_out, atol=2e-4, rtol=2e-4), "output mismatch (f32)"
    assert jnp.allclose(attn, ref_attn, atol=2e-4, rtol=2e-4), "attn mismatch (f32)"

    # 2) bf16 MXU operands + bf16 attn writeback (perf path); f32 accumulation,
    #    stored attention uses the exact division (rows sum to 1 within bf16 rounding).
    out_bf, attn_bf, _, _ = encoder_layer(x, params, n_heads=H,
                                          compute_dtype=jnp.bfloat16,
                                          attn_dtype=jnp.bfloat16)
    out_bf = jax.block_until_ready(out_bf)
    attn_bf = jax.block_until_ready(attn_bf)
    assert attn_bf.dtype == jnp.bfloat16
    assert jnp.allclose(out_bf, ref_out, atol=3e-2, rtol=3e-2), "output mismatch (bf16)"
    assert jnp.allclose(attn_bf.astype(jnp.float32), ref_attn,
                        atol=2e-2, rtol=2e-2), "attn mismatch (bf16)"

    # 3) attn writeback skipped (saves the dominant B*H*L*L HBM write when unused).
    out_na, attn_na, _, _ = encoder_layer(x, params, n_heads=H, return_attn=False)
    out_na = jax.block_until_ready(out_na)
    assert attn_na is None
    assert jnp.allclose(out_na, ref_out, atol=2e-4, rtol=2e-4), "output mismatch (no-attn)"

    print("KERNEL_OK")
</pallas_src>

<mosaic_0001>
module attributes {stable_mosaic.version = 11 : i64} {
  func.func @encoder_layer_kernel(%arg0: i32, %arg1: i32, %arg2: memref<1x8x32xf32, #tpu.memory_space<vmem>>, %arg3: memref<1x8x32xf32, #tpu.memory_space<vmem>>, %arg4: memref<32x32xf32, #tpu.memory_space<vmem>>, %arg5: memref<1x32xf32, #tpu.memory_space<vmem>>, %arg6: memref<32x64xf32, #tpu.memory_space<vmem>>, %arg7: memref<1x64xf32, #tpu.memory_space<vmem>>, %arg8: memref<32x32xf32, #tpu.memory_space<vmem>>, %arg9: memref<32x128xf32, #tpu.memory_space<vmem>>, %arg10: memref<1x128xf32, #tpu.memory_space<vmem>>, %arg11: memref<128x32xf32, #tpu.memory_space<vmem>>, %arg12: memref<6x32xf32, #tpu.memory_space<vmem>>, %arg13: memref<1x8x32xf32, #tpu.memory_space<vmem>>, %arg14: memref<1x4x8x8xf32, #tpu.memory_space<vmem>>, %arg15: memref<8x32xf32, #tpu.memory_space<vmem>>, %arg16: memref<8x32xf32, #tpu.memory_space<vmem>>) attributes {dimension_semantics = [#tpu.dimension_semantics<parallel>, #tpu.dimension_semantics<arbitrary>], iteration_bounds = array<i64: 2, 1>, scalar_prefetch = 0 : i64, scratch_operands = 2 : i64, tpu.core_type = #tpu.core_type<tc>, window_params = [{transform_indices = @transform_0, window_bounds = array<i64: 1, 8, 32>}, {transform_indices = @transform_1, window_bounds = array<i64: 1, 8, 32>}, {pipeline_mode = #tpu.pipeline_mode<synchronous>, transform_indices = @transform_2, window_bounds = array<i64: 32, 32>}, {pipeline_mode = #tpu.pipeline_mode<synchronous>, transform_indices = @transform_3, window_bounds = array<i64: 1, 32>}, {pipeline_mode = #tpu.pipeline_mode<synchronous>, transform_indices = @transform_4, window_bounds = array<i64: 32, 64>}, {pipeline_mode = #tpu.pipeline_mode<synchronous>, transform_indices = @transform_5, window_bounds = array<i64: 1, 64>}, {pipeline_mode = #tpu.pipeline_mode<synchronous>, transform_indices = @transform_6, window_bounds = array<i64: 32, 32>}, {pipeline_mode = #tpu.pipeline_mode<synchronous>, transform_indices = @transform_7, window_bounds = array<i64: 32, 128>}, {pipeline_mode = #tpu.pipeline_mode<synchronous>, transform_indices = @transform_8, window_bounds = array<i64: 1, 128>}, {pipeline_mode = #tpu.pipeline_mode<synchronous>, transform_indices = @transform_9, window_bounds = array<i64: 128, 32>}, {pipeline_mode = #tpu.pipeline_mode<synchronous>, transform_indices = @transform_10, window_bounds = array<i64: 6, 32>}, {transform_indices = @transform_11, window_bounds = array<i64: 1, 8, 32>}, {transform_indices = @transform_12, window_bounds = array<i64: 1, 4, 8, 8>}]} {
    %c0_i32 = arith.constant 0 : i32
    %0 = arith.cmpi eq, %arg1, %c0_i32 : i32
    %1 = arith.extui %0 : i1 to i32
    %c0_i32_0 = arith.constant 0 : i32
    %2 = arith.cmpi ne, %1, %c0_i32_0 : i32
    scf.if %2 {
      %c0_79 = arith.constant 0 : index
      %c0_80 = arith.constant 0 : index
      %c0_81 = arith.constant 0 : index
      %159 = vector.load %arg3[%c0_79, %c0_80, %c0_81] : memref<1x8x32xf32, #tpu.memory_space<vmem>>, vector<1x8x32xf32>
      %160 = vector.shape_cast %159 : vector<1x8x32xf32> to vector<8x32xf32>
      %c0_82 = arith.constant 0 : index
      %c0_83 = arith.constant 0 : index
      %161 = vector.load %arg6[%c0_82, %c0_83] : memref<32x64xf32, #tpu.memory_space<vmem>>, vector<32x64xf32>
      %cst_84 = arith.constant dense<0.000000e+00> : vector<8x64xf32>
      %162 = tpu.matmul %160, %161, %cst_84 {dimension_numbers = #tpu.dot_dimension_numbers<[1], [0], [0], [1], [0, 0, 1, 1], [], []>} : vector<8x32xf32>, vector<32x64xf32>, vector<8x64xf32> -> vector<8x64xf32>
      %c0_85 = arith.constant 0 : index
      %c0_86 = arith.constant 0 : index
      %163 = vector.load %arg7[%c0_85, %c0_86] : memref<1x64xf32, #tpu.memory_space<vmem>>, vector<1x64xf32>
      %164 = vector.broadcast %163 : vector<1x64xf32> to vector<8x64xf32>
      %165 = arith.addf %162, %164 : vector<8x64xf32>
      %166 = vector.extract_strided_slice %165 {offsets = [0, 0], sizes = [8, 32], strides = [1, 1]} : vector<8x64xf32> to vector<8x32xf32>
      %c0_87 = arith.constant 0 : index
      %c0_88 = arith.constant 0 : index
      %167 = vector.load %arg15[%c0_87, %c0_88] : memref<8x32xf32, #tpu.memory_space<vmem>>, vector<8x32xf32>
      tpu.vector_store %arg15[%c0_87, %c0_88], %166 {strides = array<i32>} : memref<8x32xf32, #tpu.memory_space<vmem>>, vector<8x32xf32>,
      %168 = vector.extract_strided_slice %165 {offsets = [0, 32], sizes = [8, 32], strides = [1, 1]} : vector<8x64xf32> to vector<8x32xf32>
      %c0_89 = arith.constant 0 : index
      %c0_90 = arith.constant 0 : index
      %169 = vector.load %arg16[%c0_89, %c0_90] : memref<8x32xf32, #tpu.memory_space<vmem>>, vector<8x32xf32>
      tpu.vector_store %arg16[%c0_89, %c0_90], %168 {strides = array<i32>} : memref<8x32xf32, #tpu.memory_space<vmem>>, vector<8x32xf32>,
    } else {
    }
    %c0 = arith.constant 0 : index
    %c0_1 = arith.constant 0 : index
    %c0_2 = arith.constant 0 : index
    %3 = vector.load %arg2[%c0, %c0_1, %c0_2] : memref<1x8x32xf32, #tpu.memory_space<vmem>>, vector<1x8x32xf32>
    %4 = vector.shape_cast %3 : vector<1x8x32xf32> to vector<8x32xf32>
    %c0_3 = arith.constant 0 : index
    %c0_4 = arith.constant 0 : index
    %5 = vector.load %arg4[%c0_3, %c0_4] : memref<32x32xf32, #tpu.memory_space<vmem>>, vector<32x32xf32>
    %cst = arith.constant dense<0.000000e+00> : vector<8x32xf32>
    %6 = tpu.matmul %4, %5, %cst {dimension_numbers = #tpu.dot_dimension_numbers<[1], [0], [0], [1], [0, 0, 1, 1], [], []>} : vector<8x32xf32>, vector<32x32xf32>, vector<8x32xf32> -> vector<8x32xf32>
    %c0_5 = arith.constant 0 : index
    %c0_6 = arith.constant 0 : index
    %7 = vector.load %arg5[%c0_5, %c0_6] : memref<1x32xf32, #tpu.memory_space<vmem>>, vector<1x32xf32>
    %8 = vector.broadcast %7 : vector<1x32xf32> to vector<8x32xf32>
    %9 = arith.addf %6, %8 : vector<8x32xf32>
    %c0_7 = arith.constant 0 : index
    %c0_8 = arith.constant 0 : index
    %10 = vector.load %arg15[%c0_7, %c0_8] : memref<8x32xf32, #tpu.memory_space<vmem>>, vector<8x32xf32>
    %c0_9 = arith.constant 0 : index
    %c0_10 = arith.constant 0 : index
    %11 = vector.load %arg16[%c0_9, %c0_10] : memref<8x32xf32, #tpu.memory_space<vmem>>, vector<8x32xf32>
    %12 = vector.extract_strided_slice %9 {offsets = [0, 0], sizes = [8, 8], strides = [1, 1]} : vector<8x32xf32> to vector<8x8xf32>
    %13 = vector.extract_strided_slice %10 {offsets = [0, 0], sizes = [8, 8], strides = [1, 1]} : vector<8x32xf32> to vector<8x8xf32>
    %14 = vector.extract_strided_slice %11 {offsets = [0, 0], sizes = [8, 8], strides = [1, 1]} : vector<8x32xf32> to vector<8x8xf32>
    %cst_11 = arith.constant dense<0.000000e+00> : vector<8x8xf32>
    %15 = tpu.matmul %12, %13, %cst_11 {dimension_numbers = #tpu.dot_dimension_numbers<[1], [1], [0], [0], [0, 0, 1, 0], [], []>} : vector<8x8xf32>, vector<8x8xf32>, vector<8x8xf32> -> vector<8x8xf32>
    %cst_12 = arith.constant 0.353553385 : f32
    %16 = vector.broadcast %cst_12 : f32 to vector<8x8xf32>
    %17 = arith.mulf %15, %16 : vector<8x8xf32>
    %cst_13 = arith.constant dense<0xFF800000> : vector<8xf32>
    %18 = vector.multi_reduction <maximumf>, %17, %cst_13 [1] : vector<8x8xf32> to vector<8xf32>
    %19 = vector.shape_cast %18 : vector<8xf32> to vector<8x1xf32>
    %20 = vector.broadcast %19 : vector<8x1xf32> to vector<8x8xf32>
    %21 = arith.subf %17, %20 : vector<8x8xf32>
    %22 = math.exp %21 : vector<8x8xf32>
    %cst_14 = arith.constant dense<0.000000e+00> : vector<8xf32>
    %23 = vector.multi_reduction <add>, %22, %cst_14 [1] : vector<8x8xf32> to vector<8xf32>
    %24 = vector.shape_cast %23 : vector<8xf32> to vector<8x1xf32>
    %25 = vector.broadcast %24 : vector<8x1xf32> to vector<8x8xf32>
    %26 = arith.divf %22, %25 : vector<8x8xf32>
    %c0_15 = arith.constant 0 : index
    %c0_16 = arith.constant 0 : index
    %c0_17 = arith.constant 0 : index
    %c0_18 = arith.constant 0 : index
    %27 = vector.load %arg14[%c0_15, %c0_16, %c0_17, %c0_18] : memref<1x4x8x8xf32, #tpu.memory_space<vmem>>, vector<1x1x8x8xf32>
    %28 = vector.shape_cast %27 : vector<1x1x8x8xf32> to vector<8x8xf32>
    %29 = vector.shape_cast %26 : vector<8x8xf32> to vector<1x1x8x8xf32>
    tpu.vector_store %arg14[%c0_15, %c0_16, %c0_17, %c0_18], %29 {strides = array<i32>} : memref<1x4x8x8xf32, #tpu.memory_space<vmem>>, vector<1x1x8x8xf32>,
    %cst_19 = arith.constant dense<0.000000e+00> : vector<8x8xf32>
    %30 = tpu.matmul %26, %14, %cst_19 {dimension_numbers = #tpu.dot_dimension_numbers<[1], [0], [0], [1], [0, 0, 1, 1], [], []>} : vector<8x8xf32>, vector<8x8xf32>, vector<8x8xf32> -> vector<8x8xf32>
    %31 = vector.extract_strided_slice %9 {offsets = [0, 8], sizes = [8, 8], strides = [1, 1]} : vector<8x32xf32> to vector<8x8xf32>
    %32 = vector.extract_strided_slice %10 {offsets = [0, 8], sizes = [8, 8], strides = [1, 1]} : vector<8x32xf32> to vector<8x8xf32>
    %33 = vector.extract_strided_slice %11 {offsets = [0, 8], sizes = [8, 8], strides = [1, 1]} : vector<8x32xf32> to vector<8x8xf32>
    %cst_20 = arith.constant dense<0.000000e+00> : vector<8x8xf32>
    %34 = tpu.matmul %31, %32, %cst_20 {dimension_numbers = #tpu.dot_dimension_numbers<[1], [1], [0], [0], [0, 0, 1, 0], [], []>} : vector<8x8xf32>, vector<8x8xf32>, vector<8x8xf32> -> vector<8x8xf32>
    %cst_21 = arith.constant 0.353553385 : f32
    %35 = vector.broadcast %cst_21 : f32 to vector<8x8xf32>
    %36 = arith.mulf %34, %35 : vector<8x8xf32>
    %cst_22 = arith.constant dense<0xFF800000> : vector<8xf32>
    %37 = vector.multi_reduction <maximumf>, %36, %cst_22 [1] : vector<8x8xf32> to vector<8xf32>
    %38 = vector.shape_cast %37 : vector<8xf32> to vector<8x1xf32>
    %39 = vector.broadcast %38 : vector<8x1xf32> to vector<8x8xf32>
    %40 = arith.subf %36, %39 : vector<8x8xf32>
    %41 = math.exp %40 : vector<8x8xf32>
    %cst_23 = arith.constant dense<0.000000e+00> : vector<8xf32>
    %42 = vector.multi_reduction <add>, %41, %cst_23 [1] : vector<8x8xf32> to vector<8xf32>
    %43 = vector.shape_cast %42 : vector<8xf32> to vector<8x1xf32>
    %44 = vector.broadcast %43 : vector<8x1xf32> to vector<8x8xf32>
    %45 = arith.divf %41, %44 : vector<8x8xf32>
    %c0_24 = arith.constant 0 : index
    %c1 = arith.constant 1 : index
    %c0_25 = arith.constant 0 : index
    %c0_26 = arith.constant 0 : index
    %46 = vector.load %arg14[%c0_24, %c1, %c0_25, %c0_26] : memref<1x4x8x8xf32, #tpu.memory_space<vmem>>, vector<1x1x8x8xf32>
    %47 = vector.shape_cast %46 : vector<1x1x8x8xf32> to vector<8x8xf32>
    %48 = vector.shape_cast %45 : vector<8x8xf32> to vector<1x1x8x8xf32>
    tpu.vector_store %arg14[%c0_24, %c1, %c0_25, %c0_26], %48 {strides = array<i32>} : memref<1x4x8x8xf32, #tpu.memory_space<vmem>>, vector<1x1x8x8xf32>,
    %cst_27 = arith.constant dense<0.000000e+00> : vector<8x8xf32>
    %49 = tpu.matmul %45, %33, %cst_27 {dimension_numbers = #tpu.dot_dimension_numbers<[1], [0], [0], [1], [0, 0, 1, 1], [], []>} : vector<8x8xf32>, vector<8x8xf32>, vector<8x8xf32> -> vector<8x8xf32>
    %50 = vector.extract_strided_slice %9 {offsets = [0, 16], sizes = [8, 8], strides = [1, 1]} : vector<8x32xf32> to vector<8x8xf32>
    %51 = vector.extract_strided_slice %10 {offsets = [0, 16], sizes = [8, 8], strides = [1, 1]} : vector<8x32xf32> to vector<8x8xf32>
    %52 = vector.extract_strided_slice %11 {offsets = [0, 16], sizes = [8, 8], strides = [1, 1]} : vector<8x32xf32> to vector<8x8xf32>
    %cst_28 = arith.constant dense<0.000000e+00> : vector<8x8xf32>
    %53 = tpu.matmul %50, %51, %cst_28 {dimension_numbers = #tpu.dot_dimension_numbers<[1], [1], [0], [0], [0, 0, 1, 0], [], []>} : vector<8x8xf32>, vector<8x8xf32>, vector<8x8xf32> -> vector<8x8xf32>
    %cst_29 = arith.constant 0.353553385 : f32
    %54 = vector.broadcast %cst_29 : f32 to vector<8x8xf32>
    %55 = arith.mulf %53, %54 : vector<8x8xf32>
    %cst_30 = arith.constant dense<0xFF800000> : vector<8xf32>
    %56 = vector.multi_reduction <maximumf>, %55, %cst_30 [1] : vector<8x8xf32> to vector<8xf32>
    %57 = vector.shape_cast %56 : vector<8xf32> to vector<8x1xf32>
    %58 = vector.broadcast %57 : vector<8x1xf32> to vector<8x8xf32>
    %59 = arith.subf %55, %58 : vector<8x8xf32>
    %60 = math.exp %59 : vector<8x8xf32>
    %cst_31 = arith.constant dense<0.000000e+00> : vector<8xf32>
    %61 = vector.multi_reduction <add>, %60, %cst_31 [1] : vector<8x8xf32> to vector<8xf32>
    %62 = vector.shape_cast %61 : vector<8xf32> to vector<8x1xf32>
    %63 = vector.broadcast %62 : vector<8x1xf32> to vector<8x8xf32>
    %64 = arith.divf %60, %63 : vector<8x8xf32>
    %c0_32 = arith.constant 0 : index
    %c2 = arith.constant 2 : index
    %c0_33 = arith.constant 0 : index
    %c0_34 = arith.constant 0 : index
    %65 = vector.load %arg14[%c0_32, %c2, %c0_33, %c0_34] : memref<1x4x8x8xf32, #tpu.memory_space<vmem>>, vector<1x1x8x8xf32>
    %66 = vector.shape_cast %65 : vector<1x1x8x8xf32> to vector<8x8xf32>
    %67 = vector.shape_cast %64 : vector<8x8xf32> to vector<1x1x8x8xf32>
    tpu.vector_store %arg14[%c0_32, %c2, %c0_33, %c0_34], %67 {strides = array<i32>} : memref<1x4x8x8xf32, #tpu.memory_space<vmem>>, vector<1x1x8x8xf32>,
    %cst_35 = arith.constant dense<0.000000e+00> : vector<8x8xf32>
    %68 = tpu.matmul %64, %52, %cst_35 {dimension_numbers = #tpu.dot_dimension_numbers<[1], [0], [0], [1], [0, 0, 1, 1], [], []>} : vector<8x8xf32>, vector<8x8xf32>, vector<8x8xf32> -> vector<8x8xf32>
    %69 = vector.extract_strided_slice %9 {offsets = [0, 24], sizes = [8, 8], strides = [1, 1]} : vector<8x32xf32> to vector<8x8xf32>
    %70 = vector.extract_strided_slice %10 {offsets = [0, 24], sizes = [8, 8], strides = [1, 1]} : vector<8x32xf32> to vector<8x8xf32>
    %71 = vector.extract_strided_slice %11 {offsets = [0, 24], sizes = [8, 8], strides = [1, 1]} : vector<8x32xf32> to vector<8x8xf32>
    %cst_36 = arith.constant dense<0.000000e+00> : vector<8x8xf32>
    %72 = tpu.matmul %69, %70, %cst_36 {dimension_numbers = #tpu.dot_dimension_numbers<[1], [1], [0], [0], [0, 0, 1, 0], [], []>} : vector<8x8xf32>, vector<8x8xf32>, vector<8x8xf32> -> vector<8x8xf32>
    %cst_37 = arith.constant 0.353553385 : f32
    %73 = vector.broadcast %cst_37 : f32 to vector<8x8xf32>
    %74 = arith.mulf %72, %73 : vector<8x8xf32>
    %cst_38 = arith.constant dense<0xFF800000> : vector<8xf32>
    %75 = vector.multi_reduction <maximumf>, %74, %cst_38 [1] : vector<8x8xf32> to vector<8xf32>
    %76 = vector.shape_cast %75 : vector<8xf32> to vector<8x1xf32>
    %77 = vector.broadcast %76 : vector<8x1xf32> to vector<8x8xf32>
    %78 = arith.subf %74, %77 : vector<8x8xf32>
    %79 = math.exp %78 : vector<8x8xf32>
    %cst_39 = arith.constant dense<0.000000e+00> : vector<8xf32>
    %80 = vector.multi_reduction <add>, %79, %cst_39 [1] : vector<8x8xf32> to vector<8xf32>
    %81 = vector.shape_cast %80 : vector<8xf32> to vector<8x1xf32>
    %82 = vector.broadcast %81 : vector<8x1xf32> to vector<8x8xf32>
    %83 = arith.divf %79, %82 : vector<8x8xf32>
    %c0_40 = arith.constant 0 : index
    %c3 = arith.constant 3 : index
    %c0_41 = arith.constant 0 : index
    %c0_42 = arith.constant 0 : index
    %84 = vector.load %arg14[%c0_40, %c3, %c0_41, %c0_42] : memref<1x4x8x8xf32, #tpu.memory_space<vmem>>, vector<1x1x8x8xf32>
    %85 = vector.shape_cast %84 : vector<1x1x8x8xf32> to vector<8x8xf32>
    %86 = vector.shape_cast %83 : vector<8x8xf32> to vector<1x1x8x8xf32>
    tpu.vector_store %arg14[%c0_40, %c3, %c0_41, %c0_42], %86 {strides = array<i32>} : memref<1x4x8x8xf32, #tpu.memory_space<vmem>>, vector<1x1x8x8xf32>,
    %cst_43 = arith.constant dense<0.000000e+00> : vector<8x8xf32>
    %87 = tpu.matmul %83, %71, %cst_43 {dimension_numbers = #tpu.dot_dimension_numbers<[1], [0], [0], [1], [0, 0, 1, 1], [], []>} : vector<8x8xf32>, vector<8x8xf32>, vector<8x8xf32> -> vector<8x8xf32>
    %88 = tpu.concatenate %30, %49, %68, %87 in 1 : vector<8x8xf32>, vector<8x8xf32>, vector<8x8xf32>, vector<8x8xf32> -> vector<8x32xf32>
    %c0_44 = arith.constant 0 : index
    %c0_45 = arith.constant 0 : index
    %89 = vector.load %arg12[%c0_44, %c0_45] : memref<6x32xf32, #tpu.memory_space<vmem>>, vector<1x32xf32>
    %c1_46 = arith.constant 1 : index
    %c0_47 = arith.constant 0 : index
    %90 = vector.load %arg12[%c1_46, %c0_47] : memref<6x32xf32, #tpu.memory_space<vmem>>, vector<1x32xf32>
    %c2_48 = arith.constant 2 : index
    %c0_49 = arith.constant 0 : index
    %91 = vector.load %arg12[%c2_48, %c0_49] : memref<6x32xf32, #tpu.memory_space<vmem>>, vector<1x32xf32>
    %c3_50 = arith.constant 3 : index
    %c0_51 = arith.constant 0 : index
    %92 = vector.load %arg12[%c3_50, %c0_51] : memref<6x32xf32, #tpu.memory_space<vmem>>, vector<1x32xf32>
    %c4 = arith.constant 4 : index
    %c0_52 = arith.constant 0 : index
    %93 = vector.load %arg12[%c4, %c0_52] : memref<6x32xf32, #tpu.memory_space<vmem>>, vector<1x32xf32>
    %c5 = arith.constant 5 : index
    %c0_53 = arith.constant 0 : index
    %94 = vector.load %arg12[%c5, %c0_53] : memref<6x32xf32, #tpu.memory_space<vmem>>, vector<1x32xf32>
    %c0_54 = arith.constant 0 : index
    %c0_55 = arith.constant 0 : index
    %95 = vector.load %arg8[%c0_54, %c0_55] : memref<32x32xf32, #tpu.memory_space<vmem>>, vector<32x32xf32>
    %cst_56 = arith.constant dense<0.000000e+00> : vector<8x32xf32>
    %96 = tpu.matmul %88, %95, %cst_56 {dimension_numbers = #tpu.dot_dimension_numbers<[1], [0], [0], [1], [0, 0, 1, 1], [], []>} : vector<8x32xf32>, vector<32x32xf32>, vector<8x32xf32> -> vector<8x32xf32>
    %97 = vector.broadcast %89 : vector<1x32xf32> to vector<8x32xf32>
    %98 = arith.addf %96, %97 : vector<8x32xf32>
    %99 = arith.addf %4, %98 : vector<8x32xf32>
    %cst_57 = arith.constant dense<0.000000e+00> : vector<8xf32>
    %100 = vector.multi_reduction <add>, %99, %cst_57 [1] : vector<8x32xf32> to vector<8xf32>
    %101 = vector.shape_cast %100 : vector<8xf32> to vector<8x1xf32>
    %cst_58 = arith.constant 3.200000e+01 : f32
    %102 = vector.broadcast %cst_58 : f32 to vector<8x1xf32>
    %103 = arith.divf %101, %102 : vector<8x1xf32>
    %104 = vector.broadcast %103 : vector<8x1xf32> to vector<8x32xf32>
    %105 = arith.subf %99, %104 : vector<8x32xf32>
    %106 = arith.mulf %105, %105 : vector<8x32xf32>
    %cst_59 = arith.constant dense<0.000000e+00> : vector<8xf32>
    %107 = vector.multi_reduction <add>, %106, %cst_59 [1] : vector<8x32xf32> to vector<8xf32>
    %108 = vector.shape_cast %107 : vector<8xf32> to vector<8x1xf32>
    %cst_60 = arith.constant 3.200000e+01 : f32
    %109 = vector.broadcast %cst_60 : f32 to vector<8x1xf32>
    %110 = arith.divf %108, %109 : vector<8x1xf32>
    %111 = vector.broadcast %103 : vector<8x1xf32> to vector<8x32xf32>
    %112 = arith.subf %99, %111 : vector<8x32xf32>
    %cst_61 = arith.constant 9.99999974E-6 : f32
    %113 = vector.broadcast %cst_61 : f32 to vector<8x1xf32>
    %114 = arith.addf %110, %113 : vector<8x1xf32>
    %115 = math.rsqrt %114 : vector<8x1xf32>
    %116 = vector.broadcast %115 : vector<8x1xf32> to vector<8x32xf32>
    %117 = arith.mulf %112, %116 : vector<8x32xf32>
    %118 = vector.broadcast %90 : vector<1x32xf32> to vector<8x32xf32>
    %119 = arith.mulf %117, %118 : vector<8x32xf32>
    %120 = vector.broadcast %91 : vector<1x32xf32> to vector<8x32xf32>
    %121 = arith.addf %119, %120 : vector<8x32xf32>
    %c0_62 = arith.constant 0 : index
    %c0_63 = arith.constant 0 : index
    %122 = vector.load %arg9[%c0_62, %c0_63] : memref<32x128xf32, #tpu.memory_space<vmem>>, vector<32x128xf32>
    %cst_64 = arith.constant dense<0.000000e+00> : vector<8x128xf32>
    %123 = tpu.matmul %121, %122, %cst_64 {dimension_numbers = #tpu.dot_dimension_numbers<[1], [0], [0], [1], [0, 0, 1, 1], [], []>} : vector<8x32xf32>, vector<32x128xf32>, vector<8x128xf32> -> vector<8x128xf32>
    %c0_65 = arith.constant 0 : index
    %c0_66 = arith.constant 0 : index
    %124 = vector.load %arg10[%c0_65, %c0_66] : memref<1x128xf32, #tpu.memory_space<vmem>>, vector<1x128xf32>
    %125 = vector.broadcast %124 : vector<1x128xf32> to vector<8x128xf32>
    %126 = arith.addf %123, %125 : vector<8x128xf32>
    %cst_67 = arith.constant 0.000000e+00 : f32
    %127 = vector.broadcast %cst_67 : f32 to vector<8x128xf32>
    %128 = arith.maximumf %126, %127 : vector<8x128xf32>
    %c0_68 = arith.constant 0 : index
    %c0_69 = arith.constant 0 : index
    %129 = vector.load %arg11[%c0_68, %c0_69] : memref<128x32xf32, #tpu.memory_space<vmem>>, vector<128x32xf32>
    %cst_70 = arith.constant dense<0.000000e+00> : vector<8x32xf32>
    %130 = tpu.matmul %128, %129, %cst_70 {dimension_numbers = #tpu.dot_dimension_numbers<[1], [0], [0], [1], [0, 0, 1, 1], [], []>} : vector<8x128xf32>, vector<128x32xf32>, vector<8x32xf32> -> vector<8x32xf32>
    %131 = vector.broadcast %92 : vector<1x32xf32> to vector<8x32xf32>
    %132 = arith.addf %130, %131 : vector<8x32xf32>
    %133 = arith.addf %121, %132 : vector<8x32xf32>
    %cst_71 = arith.constant dense<0.000000e+00> : vector<8xf32>
    %134 = vector.multi_reduction <add>, %133, %cst_71 [1] : vector<8x32xf32> to vector<8xf32>
    %135 = vector.shape_cast %134 : vector<8xf32> to vector<8x1xf32>
    %cst_72 = arith.constant 3.200000e+01 : f32
    %136 = vector.broadcast %cst_72 : f32 to vector<8x1xf32>
    %137 = arith.divf %135, %136 : vector<8x1xf32>
    %138 = vector.broadcast %137 : vector<8x1xf32> to vector<8x32xf32>
    %139 = arith.subf %133, %138 : vector<8x32xf32>
    %140 = arith.mulf %139, %139 : vector<8x32xf32>
    %cst_73 = arith.constant dense<0.000000e+00> : vector<8xf32>
    %141 = vector.multi_reduction <add>, %140, %cst_73 [1] : vector<8x32xf32> to vector<8xf32>
    %142 = vector.shape_cast %141 : vector<8xf32> to vector<8x1xf32>
    %cst_74 = arith.constant 3.200000e+01 : f32
    %143 = vector.broadcast %cst_74 : f32 to vector<8x1xf32>
    %144 = arith.divf %142, %143 : vector<8x1xf32>
    %145 = vector.broadcast %137 : vector<8x1xf32> to vector<8x32xf32>
    %146 = arith.subf %133, %145 : vector<8x32xf32>
    %cst_75 = arith.constant 9.99999974E-6 : f32
    %147 = vector.broadcast %cst_75 : f32 to vector<8x1xf32>
    %148 = arith.addf %144, %147 : vector<8x1xf32>
    %149 = math.rsqrt %148 : vector<8x1xf32>
    %150 = vector.broadcast %149 : vector<8x1xf32> to vector<8x32xf32>
    %151 = arith.mulf %146, %150 : vector<8x32xf32>
    %152 = vector.broadcast %93 : vector<1x32xf32> to vector<8x32xf32>
    %153 = arith.mulf %151, %152 : vector<8x32xf32>
    %154 = vector.broadcast %94 : vector<1x32xf32> to vector<8x32xf32>
    %155 = arith.addf %153, %154 : vector<8x32xf32>
    %c0_76 = arith.constant 0 : index
    %c0_77 = arith.constant 0 : index
    %c0_78 = arith.constant 0 : index
    %156 = vector.load %arg13[%c0_76, %c0_77, %c0_78] : memref<1x8x32xf32, #tpu.memory_space<vmem>>, vector<1x8x32xf32>
    %157 = vector.shape_cast %156 : vector<1x8x32xf32> to vector<8x32xf32>
    %158 = vector.shape_cast %155 : vector<8x32xf32> to vector<1x8x32xf32>
    tpu.vector_store %arg13[%c0_76, %c0_77, %c0_78], %158 {strides = array<i32>} : memref<1x8x32xf32, #tpu.memory_space<vmem>>, vector<1x8x32xf32>,
    return
  }
  func.func @transform_0(%arg0: i32, %arg1: i32) -> (i32, i32, i32) {
    %c0_i32 = arith.constant 0 : i32
    %c0_i32_0 = arith.constant 0 : i32
    return %arg0, %arg1, %c0_i32 : i32, i32, i32
  }
  func.func @transform_1(%arg0: i32, %arg1: i32) -> (i32, i32, i32) {
    %c0_i32 = arith.constant 0 : i32
    %c0_i32_0 = arith.constant 0 : i32
    %c0_i32_1 = arith.constant 0 : i32
    return %arg0, %c0_i32, %c0_i32_0 : i32, i32, i32
  }
  func.func @transform_2(%arg0: i32, %arg1: i32) -> (i32, i32) {
    %c0_i32 = arith.constant 0 : i32
    %c0_i32_0 = arith.constant 0 : i32
    %c0_i32_1 = arith.constant 0 : i32
    return %c0_i32, %c0_i32_0 : i32, i32
  }
  func.func @transform_3(%arg0: i32, %arg1: i32) -> (i32, i32) {
    %c0_i32 = arith.constant 0 : i32
    %c0_i32_0 = arith.constant 0 : i32
    %c0_i32_1 = arith.constant 0 : i32
    return %c0_i32, %c0_i32_0 : i32, i32
  }
  func.func @transform_4(%arg0: i32, %arg1: i32) -> (i32, i32) {
    %c0_i32 = arith.constant 0 : i32
    %c0_i32_0 = arith.constant 0 : i32
    %c0_i32_1 = arith.constant 0 : i32
    return %c0_i32, %c0_i32_0 : i32, i32
  }
  func.func @transform_5(%arg0: i32, %arg1: i32) -> (i32, i32) {
    %c0_i32 = arith.constant 0 : i32
    %c0_i32_0 = arith.constant 0 : i32
    %c0_i32_1 = arith.constant 0 : i32
    return %c0_i32, %c0_i32_0 : i32, i32
  }
  func.func @transform_6(%arg0: i32, %arg1: i32) -> (i32, i32) {
    %c0_i32 = arith.constant 0 : i32
    %c0_i32_0 = arith.constant 0 : i32
    %c0_i32_1 = arith.constant 0 : i32
    return %c0_i32, %c0_i32_0 : i32, i32
  }
  func.func @transform_7(%arg0: i32, %arg1: i32) -> (i32, i32) {
    %c0_i32 = arith.constant 0 : i32
    %c0_i32_0 = arith.constant 0 : i32
    %c0_i32_1 = arith.constant 0 : i32
    return %c0_i32, %c0_i32_0 : i32, i32
  }
  func.func @transform_8(%arg0: i32, %arg1: i32) -> (i32, i32) {
    %c0_i32 = arith.constant 0 : i32
    %c0_i32_0 = arith.constant 0 : i32
    %c0_i32_1 = arith.constant 0 : i32
    return %c0_i32, %c0_i32_0 : i32, i32
  }
  func.func @transform_9(%arg0: i32, %arg1: i32) -> (i32, i32) {
    %c0_i32 = arith.constant 0 : i32
    %c0_i32_0 = arith.constant 0 : i32
    %c0_i32_1 = arith.constant 0 : i32
    return %c0_i32, %c0_i32_0 : i32, i32
  }
  func.func @transform_10(%arg0: i32, %arg1: i32) -> (i32, i32) {
    %c0_i32 = arith.constant 0 : i32
    %c0_i32_0 = arith.constant 0 : i32
    %c0_i32_1 = arith.constant 0 : i32
    return %c0_i32, %c0_i32_0 : i32, i32
  }
  func.func @transform_11(%arg0: i32, %arg1: i32) -> (i32, i32, i32) {
    %c0_i32 = arith.constant 0 : i32
    %c0_i32_0 = arith.constant 0 : i32
    return %arg0, %arg1, %c0_i32 : i32, i32, i32
  }
  func.func @transform_12(%arg0: i32, %arg1: i32) -> (i32, i32, i32, i32) {
    %c0_i32 = arith.constant 0 : i32
    %c0_i32_0 = arith.constant 0 : i32
    %c0_i32_1 = arith.constant 0 : i32
    return %arg0, %c0_i32, %arg1, %c0_i32_0 : i32, i32, i32, i32
  }
}

module attributes {stable_mosaic.version = 11 : i64} {
  func.func @encoder_layer_kernel(%arg0: i32, %arg1: i32, %arg2: memref<1x8x32xf32, #tpu.memory_space<vmem>>, %arg3: memref<1x8x32xf32, #tpu.memory_space<vmem>>, %arg4: memref<32x32xf32, #tpu.memory_space<vmem>>, %arg5: memref<1x32xf32, #tpu.memory_space<vmem>>, %arg6: memref<32x64xf32, #tpu.memory_space<vmem>>, %arg7: memref<1x64xf32, #tpu.memory_space<vmem>>, %arg8: memref<32x32xf32, #tpu.memory_space<vmem>>, %arg9: memref<32x128xf32, #tpu.memory_space<vmem>>, %arg10: memref<1x128xf32, #tpu.memory_space<vmem>>, %arg11: memref<128x32xf32, #tpu.memory_space<vmem>>, %arg12: memref<6x32xf32, #tpu.memory_space<vmem>>, %arg13: memref<1x8x32xf32, #tpu.memory_space<vmem>>, %arg14: memref<1x4x8x8xf32, #tpu.memory_space<vmem>>, %arg15: memref<8x32xf32, #tpu.memory_space<vmem>>, %arg16: memref<8x32xf32, #tpu.memory_space<vmem>>) attributes {dimension_semantics = [#tpu.dimension_semantics<parallel>, #tpu.dimension_semantics<arbitrary>], iteration_bounds = array<i64: 2, 1>, scalar_prefetch = 0 : i64, scratch_operands = 2 : i64, tpu.core_type = #tpu.core_type<tc>, window_params = [{transform_indices = @transform_0, window_bounds = array<i64: 1, 8, 32>}, {transform_indices = @transform_1, window_bounds = array<i64: 1, 8, 32>}, {pipeline_mode = #tpu.pipeline_mode<synchronous>, transform_indices = @transform_2, window_bounds = array<i64: 32, 32>}, {pipeline_mode = #tpu.pipeline_mode<synchronous>, transform_indices = @transform_3, window_bounds = array<i64: 1, 32>}, {pipeline_mode = #tpu.pipeline_mode<synchronous>, transform_indices = @transform_4, window_bounds = array<i64: 32, 64>}, {pipeline_mode = #tpu.pipeline_mode<synchronous>, transform_indices = @transform_5, window_bounds = array<i64: 1, 64>}, {pipeline_mode = #tpu.pipeline_mode<synchronous>, transform_indices = @transform_6, window_bounds = array<i64: 32, 32>}, {pipeline_mode = #tpu.pipeline_mode<synchronous>, transform_indices = @transform_7, window_bounds = array<i64: 32, 128>}, {pipeline_mode = #tpu.pipeline_mode<synchronous>, transform_indices = @transform_8, window_bounds = array<i64: 1, 128>}, {pipeline_mode = #tpu.pipeline_mode<synchronous>, transform_indices = @transform_9, window_bounds = array<i64: 128, 32>}, {pipeline_mode = #tpu.pipeline_mode<synchronous>, transform_indices = @transform_10, window_bounds = array<i64: 6, 32>}, {transform_indices = @transform_11, window_bounds = array<i64: 1, 8, 32>}, {transform_indices = @transform_12, window_bounds = array<i64: 1, 4, 8, 8>}]} {
    %c0_i32 = arith.constant 0 : i32
    %0 = arith.cmpi eq, %arg1, %c0_i32 : i32
    %1 = arith.extui %0 : i1 to i32
    %c0_i32_0 = arith.constant 0 : i32
    %2 = arith.cmpi ne, %1, %c0_i32_0 : i32
    scf.if %2 {
      %c0_79 = arith.constant 0 : index
      %c0_80 = arith.constant 0 : index
      %c0_81 = arith.constant 0 : index
      %159 = vector.load %arg3[%c0_79, %c0_80, %c0_81] : memref<1x8x32xf32, #tpu.memory_space<vmem>>, vector<1x8x32xf32>
      %160 = vector.shape_cast %159 : vector<1x8x32xf32> to vector<8x32xf32>
      %c0_82 = arith.constant 0 : index
      %c0_83 = arith.constant 0 : index
      %161 = vector.load %arg6[%c0_82, %c0_83] : memref<32x64xf32, #tpu.memory_space<vmem>>, vector<32x64xf32>
      %cst_84 = arith.constant dense<0.000000e+00> : vector<8x64xf32>
      %162 = tpu.matmul %160, %161, %cst_84 {dimension_numbers = #tpu.dot_dimension_numbers<[1], [0], [0], [1], [0, 0, 1, 1], [], []>} : vector<8x32xf32>, vector<32x64xf32>, vector<8x64xf32> -> vector<8x64xf32>
      %c0_85 = arith.constant 0 : index
      %c0_86 = arith.constant 0 : index
      %163 = vector.load %arg7[%c0_85, %c0_86] : memref<1x64xf32, #tpu.memory_space<vmem>>, vector<1x64xf32>
      %164 = vector.broadcast %163 : vector<1x64xf32> to vector<8x64xf32>
      %165 = arith.addf %162, %164 : vector<8x64xf32>
      %166 = vector.extract_strided_slice %165 {offsets = [0, 0], sizes = [8, 32], strides = [1, 1]} : vector<8x64xf32> to vector<8x32xf32>
      %c0_87 = arith.constant 0 : index
      %c0_88 = arith.constant 0 : index
      %167 = vector.load %arg15[%c0_87, %c0_88] : memref<8x32xf32, #tpu.memory_space<vmem>>, vector<8x32xf32>
      tpu.vector_store %arg15[%c0_87, %c0_88], %166 {strides = array<i32>} : memref<8x32xf32, #tpu.memory_space<vmem>>, vector<8x32xf32>,
      %168 = vector.extract_strided_slice %165 {offsets = [0, 32], sizes = [8, 32], strides = [1, 1]} : vector<8x64xf32> to vector<8x32xf32>
      %c0_89 = arith.constant 0 : index
      %c0_90 = arith.constant 0 : index
      %169 = vector.load %arg16[%c0_89, %c0_90] : memref<8x32xf32, #tpu.memory_space<vmem>>, vector<8x32xf32>
      tpu.vector_store %arg16[%c0_89, %c0_90], %168 {strides = array<i32>} : memref<8x32xf32, #tpu.memory_space<vmem>>, vector<8x32xf32>,
    } else {
    }
    %c0 = arith.constant 0 : index
    %c0_1 = arith.constant 0 : index
    %c0_2 = arith.constant 0 : index
    %3 = vector.load %arg2[%c0, %c0_1, %c0_2] : memref<1x8x32xf32, #tpu.memory_space<vmem>>, vector<1x8x32xf32>
    %4 = vector.shape_cast %3 : vector<1x8x32xf32> to vector<8x32xf32>
    %c0_3 = arith.constant 0 : index
    %c0_4 = arith.constant 0 : index
    %5 = vector.load %arg4[%c0_3, %c0_4] : memref<32x32xf32, #tpu.memory_space<vmem>>, vector<32x32xf32>
    %cst = arith.constant dense<0.000000e+00> : vector<8x32xf32>
    %6 = tpu.matmul %4, %5, %cst {dimension_numbers = #tpu.dot_dimension_numbers<[1], [0], [0], [1], [0, 0, 1, 1], [], []>} : vector<8x32xf32>, vector<32x32xf32>, vector<8x32xf32> -> vector<8x32xf32>
    %c0_5 = arith.constant 0 : index
    %c0_6 = arith.constant 0 : index
    %7 = vector.load %arg5[%c0_5, %c0_6] : memref<1x32xf32, #tpu.memory_space<vmem>>, vector<1x32xf32>
    %8 = vector.broadcast %7 : vector<1x32xf32> to vector<8x32xf32>
    %9 = arith.addf %6, %8 : vector<8x32xf32>
    %c0_7 = arith.constant 0 : index
    %c0_8 = arith.constant 0 : index
    %10 = vector.load %arg15[%c0_7, %c0_8] : memref<8x32xf32, #tpu.memory_space<vmem>>, vector<8x32xf32>
    %c0_9 = arith.constant 0 : index
    %c0_10 = arith.constant 0 : index
    %11 = vector.load %arg16[%c0_9, %c0_10] : memref<8x32xf32, #tpu.memory_space<vmem>>, vector<8x32xf32>
    %12 = vector.extract_strided_slice %9 {offsets = [0, 0], sizes = [8, 8], strides = [1, 1]} : vector<8x32xf32> to vector<8x8xf32>
    %13 = vector.extract_strided_slice %10 {offsets = [0, 0], sizes = [8, 8], strides = [1, 1]} : vector<8x32xf32> to vector<8x8xf32>
    %14 = vector.extract_strided_slice %11 {offsets = [0, 0], sizes = [8, 8], strides = [1, 1]} : vector<8x32xf32> to vector<8x8xf32>
    %cst_11 = arith.constant dense<0.000000e+00> : vector<8x8xf32>
    %15 = tpu.matmul %12, %13, %cst_11 {dimension_numbers = #tpu.dot_dimension_numbers<[1], [1], [0], [0], [0, 0, 1, 0], [], []>} : vector<8x8xf32>, vector<8x8xf32>, vector<8x8xf32> -> vector<8x8xf32>
    %cst_12 = arith.constant 0.353553385 : f32
    %16 = vector.broadcast %cst_12 : f32 to vector<8x8xf32>
    %17 = arith.mulf %15, %16 : vector<8x8xf32>
    %cst_13 = arith.constant dense<0xFF800000> : vector<8xf32>
    %18 = vector.multi_reduction <maximumf>, %17, %cst_13 [1] : vector<8x8xf32> to vector<8xf32>
    %19 = vector.shape_cast %18 : vector<8xf32> to vector<8x1xf32>
    %20 = vector.broadcast %19 : vector<8x1xf32> to vector<8x8xf32>
    %21 = arith.subf %17, %20 : vector<8x8xf32>
    %22 = math.exp %21 : vector<8x8xf32>
    %cst_14 = arith.constant dense<0.000000e+00> : vector<8xf32>
    %23 = vector.multi_reduction <add>, %22, %cst_14 [1] : vector<8x8xf32> to vector<8xf32>
    %24 = vector.shape_cast %23 : vector<8xf32> to vector<8x1xf32>
    %25 = vector.broadcast %24 : vector<8x1xf32> to vector<8x8xf32>
    %26 = arith.divf %22, %25 : vector<8x8xf32>
    %c0_15 = arith.constant 0 : index
    %c0_16 = arith.constant 0 : index
    %c0_17 = arith.constant 0 : index
    %c0_18 = arith.constant 0 : index
    %27 = vector.load %arg14[%c0_15, %c0_16, %c0_17, %c0_18] : memref<1x4x8x8xf32, #tpu.memory_space<vmem>>, vector<1x1x8x8xf32>
    %28 = vector.shape_cast %27 : vector<1x1x8x8xf32> to vector<8x8xf32>
    %29 = vector.shape_cast %26 : vector<8x8xf32> to vector<1x1x8x8xf32>
    tpu.vector_store %arg14[%c0_15, %c0_16, %c0_17, %c0_18], %29 {strides = array<i32>} : memref<1x4x8x8xf32, #tpu.memory_space<vmem>>, vector<1x1x8x8xf32>,
    %cst_19 = arith.constant dense<0.000000e+00> : vector<8x8xf32>
    %30 = tpu.matmul %26, %14, %cst_19 {dimension_numbers = #tpu.dot_dimension_numbers<[1], [0], [0], [1], [0, 0, 1, 1], [], []>} : vector<8x8xf32>, vector<8x8xf32>, vector<8x8xf32> -> vector<8x8xf32>
    %31 = vector.extract_strided_slice %9 {offsets = [0, 8], sizes = [8, 8], strides = [1, 1]} : vector<8x32xf32> to vector<8x8xf32>
    %32 = vector.extract_strided_slice %10 {offsets = [0, 8], sizes = [8, 8], strides = [1, 1]} : vector<8x32xf32> to vector<8x8xf32>
    %33 = vector.extract_strided_slice %11 {offsets = [0, 8], sizes = [8, 8], strides = [1, 1]} : vector<8x32xf32> to vector<8x8xf32>
    %cst_20 = arith.constant dense<0.000000e+00> : vector<8x8xf32>
    %34 = tpu.matmul %31, %32, %cst_20 {dimension_numbers = #tpu.dot_dimension_numbers<[1], [1], [0], [0], [0, 0, 1, 0], [], []>} : vector<8x8xf32>, vector<8x8xf32>, vector<8x8xf32> -> vector<8x8xf32>
    %cst_21 = arith.constant 0.353553385 : f32
    %35 = vector.broadcast %cst_21 : f32 to vector<8x8xf32>
    %36 = arith.mulf %34, %35 : vector<8x8xf32>
    %cst_22 = arith.constant dense<0xFF800000> : vector<8xf32>
    %37 = vector.multi_reduction <maximumf>, %36, %cst_22 [1] : vector<8x8xf32> to vector<8xf32>
    %38 = vector.shape_cast %37 : vector<8xf32> to vector<8x1xf32>
    %39 = vector.broadcast %38 : vector<8x1xf32> to vector<8x8xf32>
    %40 = arith.subf %36, %39 : vector<8x8xf32>
    %41 = math.exp %40 : vector<8x8xf32>
    %cst_23 = arith.constant dense<0.000000e+00> : vector<8xf32>
    %42 = vector.multi_reduction <add>, %41, %cst_23 [1] : vector<8x8xf32> to vector<8xf32>
    %43 = vector.shape_cast %42 : vector<8xf32> to vector<8x1xf32>
    %44 = vector.broadcast %43 : vector<8x1xf32> to vector<8x8xf32>
    %45 = arith.divf %41, %44 : vector<8x8xf32>
    %c0_24 = arith.constant 0 : index
    %c1 = arith.constant 1 : index
    %c0_25 = arith.constant 0 : index
    %c0_26 = arith.constant 0 : index
    %46 = vector.load %arg14[%c0_24, %c1, %c0_25, %c0_26] : memref<1x4x8x8xf32, #tpu.memory_space<vmem>>, vector<1x1x8x8xf32>
    %47 = vector.shape_cast %46 : vector<1x1x8x8xf32> to vector<8x8xf32>
    %48 = vector.shape_cast %45 : vector<8x8xf32> to vector<1x1x8x8xf32>
    tpu.vector_store %arg14[%c0_24, %c1, %c0_25, %c0_26], %48 {strides = array<i32>} : memref<1x4x8x8xf32, #tpu.memory_space<vmem>>, vector<1x1x8x8xf32>,
    %cst_27 = arith.constant dense<0.000000e+00> : vector<8x8xf32>
    %49 = tpu.matmul %45, %33, %cst_27 {dimension_numbers = #tpu.dot_dimension_numbers<[1], [0], [0], [1], [0, 0, 1, 1], [], []>} : vector<8x8xf32>, vector<8x8xf32>, vector<8x8xf32> -> vector<8x8xf32>
    %50 = vector.extract_strided_slice %9 {offsets = [0, 16], sizes = [8, 8], strides = [1, 1]} : vector<8x32xf32> to vector<8x8xf32>
    %51 = vector.extract_strided_slice %10 {offsets = [0, 16], sizes = [8, 8], strides = [1, 1]} : vector<8x32xf32> to vector<8x8xf32>
    %52 = vector.extract_strided_slice %11 {offsets = [0, 16], sizes = [8, 8], strides = [1, 1]} : vector<8x32xf32> to vector<8x8xf32>
    %cst_28 = arith.constant dense<0.000000e+00> : vector<8x8xf32>
    %53 = tpu.matmul %50, %51, %cst_28 {dimension_numbers = #tpu.dot_dimension_numbers<[1], [1], [0], [0], [0, 0, 1, 0], [], []>} : vector<8x8xf32>, vector<8x8xf32>, vector<8x8xf32> -> vector<8x8xf32>
    %cst_29 = arith.constant 0.353553385 : f32
    %54 = vector.broadcast %cst_29 : f32 to vector<8x8xf32>
    %55 = arith.mulf %53, %54 : vector<8x8xf32>
    %cst_30 = arith.constant dense<0xFF800000> : vector<8xf32>
    %56 = vector.multi_reduction <maximumf>, %55, %cst_30 [1] : vector<8x8xf32> to vector<8xf32>
    %57 = vector.shape_cast %56 : vector<8xf32> to vector<8x1xf32>
    %58 = vector.broadcast %57 : vector<8x1xf32> to vector<8x8xf32>
    %59 = arith.subf %55, %58 : vector<8x8xf32>
    %60 = math.exp %59 : vector<8x8xf32>
    %cst_31 = arith.constant dense<0.000000e+00> : vector<8xf32>
    %61 = vector.multi_reduction <add>, %60, %cst_31 [1] : vector<8x8xf32> to vector<8xf32>
    %62 = vector.shape_cast %61 : vector<8xf32> to vector<8x1xf32>
    %63 = vector.broadcast %62 : vector<8x1xf32> to vector<8x8xf32>
    %64 = arith.divf %60, %63 : vector<8x8xf32>
    %c0_32 = arith.constant 0 : index
    %c2 = arith.constant 2 : index
    %c0_33 = arith.constant 0 : index
    %c0_34 = arith.constant 0 : index
    %65 = vector.load %arg14[%c0_32, %c2, %c0_33, %c0_34] : memref<1x4x8x8xf32, #tpu.memory_space<vmem>>, vector<1x1x8x8xf32>
    %66 = vector.shape_cast %65 : vector<1x1x8x8xf32> to vector<8x8xf32>
    %67 = vector.shape_cast %64 : vector<8x8xf32> to vector<1x1x8x8xf32>
    tpu.vector_store %arg14[%c0_32, %c2, %c0_33, %c0_34], %67 {strides = array<i32>} : memref<1x4x8x8xf32, #tpu.memory_space<vmem>>, vector<1x1x8x8xf32>,
    %cst_35 = arith.constant dense<0.000000e+00> : vector<8x8xf32>
    %68 = tpu.matmul %64, %52, %cst_35 {dimension_numbers = #tpu.dot_dimension_numbers<[1], [0], [0], [1], [0, 0, 1, 1], [], []>} : vector<8x8xf32>, vector<8x8xf32>, vector<8x8xf32> -> vector<8x8xf32>
    %69 = vector.extract_strided_slice %9 {offsets = [0, 24], sizes = [8, 8], strides = [1, 1]} : vector<8x32xf32> to vector<8x8xf32>
    %70 = vector.extract_strided_slice %10 {offsets = [0, 24], sizes = [8, 8], strides = [1, 1]} : vector<8x32xf32> to vector<8x8xf32>
    %71 = vector.extract_strided_slice %11 {offsets = [0, 24], sizes = [8, 8], strides = [1, 1]} : vector<8x32xf32> to vector<8x8xf32>
    %cst_36 = arith.constant dense<0.000000e+00> : vector<8x8xf32>
    %72 = tpu.matmul %69, %70, %cst_36 {dimension_numbers = #tpu.dot_dimension_numbers<[1], [1], [0], [0], [0, 0, 1, 0], [], []>} : vector<8x8xf32>, vector<8x8xf32>, vector<8x8xf32> -> vector<8x8xf32>
    %cst_37 = arith.constant 0.353553385 : f32
    %73 = vector.broadcast %cst_37 : f32 to vector<8x8xf32>
    %74 = arith.mulf %72, %73 : vector<8x8xf32>
    %cst_38 = arith.constant dense<0xFF800000> : vector<8xf32>
    %75 = vector.multi_reduction <maximumf>, %74, %cst_38 [1] : vector<8x8xf32> to vector<8xf32>
    %76 = vector.shape_cast %75 : vector<8xf32> to vector<8x1xf32>
    %77 = vector.broadcast %76 : vector<8x1xf32> to vector<8x8xf32>
    %78 = arith.subf %74, %77 : vector<8x8xf32>
    %79 = math.exp %78 : vector<8x8xf32>
    %cst_39 = arith.constant dense<0.000000e+00> : vector<8xf32>
    %80 = vector.multi_reduction <add>, %79, %cst_39 [1] : vector<8x8xf32> to vector<8xf32>
    %81 = vector.shape_cast %80 : vector<8xf32> to vector<8x1xf32>
    %82 = vector.broadcast %81 : vector<8x1xf32> to vector<8x8xf32>
    %83 = arith.divf %79, %82 : vector<8x8xf32>
    %c0_40 = arith.constant 0 : index
    %c3 = arith.constant 3 : index
    %c0_41 = arith.constant 0 : index
    %c0_42 = arith.constant 0 : index
    %84 = vector.load %arg14[%c0_40, %c3, %c0_41, %c0_42] : memref<1x4x8x8xf32, #tpu.memory_space<vmem>>, vector<1x1x8x8xf32>
    %85 = vector.shape_cast %84 : vector<1x1x8x8xf32> to vector<8x8xf32>
    %86 = vector.shape_cast %83 : vector<8x8xf32> to vector<1x1x8x8xf32>
    tpu.vector_store %arg14[%c0_40, %c3, %c0_41, %c0_42], %86 {strides = array<i32>} : memref<1x4x8x8xf32, #tpu.memory_space<vmem>>, vector<1x1x8x8xf32>,
    %cst_43 = arith.constant dense<0.000000e+00> : vector<8x8xf32>
    %87 = tpu.matmul %83, %71, %cst_43 {dimension_numbers = #tpu.dot_dimension_numbers<[1], [0], [0], [1], [0, 0, 1, 1], [], []>} : vector<8x8xf32>, vector<8x8xf32>, vector<8x8xf32> -> vector<8x8xf32>
    %88 = tpu.concatenate %30, %49, %68, %87 in 1 : vector<8x8xf32>, vector<8x8xf32>, vector<8x8xf32>, vector<8x8xf32> -> vector<8x32xf32>
    %c0_44 = arith.constant 0 : index
    %c0_45 = arith.constant 0 : index
    %89 = vector.load %arg12[%c0_44, %c0_45] : memref<6x32xf32, #tpu.memory_space<vmem>>, vector<1x32xf32>
    %c1_46 = arith.constant 1 : index
    %c0_47 = arith.constant 0 : index
    %90 = vector.load %arg12[%c1_46, %c0_47] : memref<6x32xf32, #tpu.memory_space<vmem>>, vector<1x32xf32>
    %c2_48 = arith.constant 2 : index
    %c0_49 = arith.constant 0 : index
    %91 = vector.load %arg12[%c2_48, %c0_49] : memref<6x32xf32, #tpu.memory_space<vmem>>, vector<1x32xf32>
    %c3_50 = arith.constant 3 : index
    %c0_51 = arith.constant 0 : index
    %92 = vector.load %arg12[%c3_50, %c0_51] : memref<6x32xf32, #tpu.memory_space<vmem>>, vector<1x32xf32>
    %c4 = arith.constant 4 : index
    %c0_52 = arith.constant 0 : index
    %93 = vector.load %arg12[%c4, %c0_52] : memref<6x32xf32, #tpu.memory_space<vmem>>, vector<1x32xf32>
    %c5 = arith.constant 5 : index
    %c0_53 = arith.constant 0 : index
    %94 = vector.load %arg12[%c5, %c0_53] : memref<6x32xf32, #tpu.memory_space<vmem>>, vector<1x32xf32>
    %c0_54 = arith.constant 0 : index
    %c0_55 = arith.constant 0 : index
    %95 = vector.load %arg8[%c0_54, %c0_55] : memref<32x32xf32, #tpu.memory_space<vmem>>, vector<32x32xf32>
    %cst_56 = arith.constant dense<0.000000e+00> : vector<8x32xf32>
    %96 = tpu.matmul %88, %95, %cst_56 {dimension_numbers = #tpu.dot_dimension_numbers<[1], [0], [0], [1], [0, 0, 1, 1], [], []>} : vector<8x32xf32>, vector<32x32xf32>, vector<8x32xf32> -> vector<8x32xf32>
    %97 = vector.broadcast %89 : vector<1x32xf32> to vector<8x32xf32>
    %98 = arith.addf %96, %97 : vector<8x32xf32>
    %99 = arith.addf %4, %98 : vector<8x32xf32>
    %cst_57 = arith.constant dense<0.000000e+00> : vector<8xf32>
    %100 = vector.multi_reduction <add>, %99, %cst_57 [1] : vector<8x32xf32> to vector<8xf32>
    %101 = vector.shape_cast %100 : vector<8xf32> to vector<8x1xf32>
    %cst_58 = arith.constant 3.200000e+01 : f32
    %102 = vector.broadcast %cst_58 : f32 to vector<8x1xf32>
    %103 = arith.divf %101, %102 : vector<8x1xf32>
    %104 = vector.broadcast %103 : vector<8x1xf32> to vector<8x32xf32>
    %105 = arith.subf %99, %104 : vector<8x32xf32>
    %106 = arith.mulf %105, %105 : vector<8x32xf32>
    %cst_59 = arith.constant dense<0.000000e+00> : vector<8xf32>
    %107 = vector.multi_reduction <add>, %106, %cst_59 [1] : vector<8x32xf32> to vector<8xf32>
    %108 = vector.shape_cast %107 : vector<8xf32> to vector<8x1xf32>
    %cst_60 = arith.constant 3.200000e+01 : f32
    %109 = vector.broadcast %cst_60 : f32 to vector<8x1xf32>
    %110 = arith.divf %108, %109 : vector<8x1xf32>
    %111 = vector.broadcast %103 : vector<8x1xf32> to vector<8x32xf32>
    %112 = arith.subf %99, %111 : vector<8x32xf32>
    %cst_61 = arith.constant 9.99999974E-6 : f32
    %113 = vector.broadcast %cst_61 : f32 to vector<8x1xf32>
    %114 = arith.addf %110, %113 : vector<8x1xf32>
    %115 = math.rsqrt %114 : vector<8x1xf32>
    %116 = vector.broadcast %115 : vector<8x1xf32> to vector<8x32xf32>
    %117 = arith.mulf %112, %116 : vector<8x32xf32>
    %118 = vector.broadcast %90 : vector<1x32xf32> to vector<8x32xf32>
    %119 = arith.mulf %117, %118 : vector<8x32xf32>
    %120 = vector.broadcast %91 : vector<1x32xf32> to vector<8x32xf32>
    %121 = arith.addf %119, %120 : vector<8x32xf32>
    %c0_62 = arith.constant 0 : index
    %c0_63 = arith.constant 0 : index
    %122 = vector.load %arg9[%c0_62, %c0_63] : memref<32x128xf32, #tpu.memory_space<vmem>>, vector<32x128xf32>
    %cst_64 = arith.constant dense<0.000000e+00> : vector<8x128xf32>
    %123 = tpu.matmul %121, %122, %cst_64 {dimension_numbers = #tpu.dot_dimension_numbers<[1], [0], [0], [1], [0, 0, 1, 1], [], []>} : vector<8x32xf32>, vector<32x128xf32>, vector<8x128xf32> -> vector<8x128xf32>
    %c0_65 = arith.constant 0 : index
    %c0_66 = arith.constant 0 : index
    %124 = vector.load %arg10[%c0_65, %c0_66] : memref<1x128xf32, #tpu.memory_space<vmem>>, vector<1x128xf32>
    %125 = vector.broadcast %124 : vector<1x128xf32> to vector<8x128xf32>
    %126 = arith.addf %123, %125 : vector<8x128xf32>
    %cst_67 = arith.constant 0.000000e+00 : f32
    %127 = vector.broadcast %cst_67 : f32 to vector<8x128xf32>
    %128 = arith.maximumf %126, %127 : vector<8x128xf32>
    %c0_68 = arith.constant 0 : index
    %c0_69 = arith.constant 0 : index
    %129 = vector.load %arg11[%c0_68, %c0_69] : memref<128x32xf32, #tpu.memory_space<vmem>>, vector<128x32xf32>
    %cst_70 = arith.constant dense<0.000000e+00> : vector<8x32xf32>
    %130 = tpu.matmul %128, %129, %cst_70 {dimension_numbers = #tpu.dot_dimension_numbers<[1], [0], [0], [1], [0, 0, 1, 1], [], []>} : vector<8x128xf32>, vector<128x32xf32>, vector<8x32xf32> -> vector<8x32xf32>
    %131 = vector.broadcast %92 : vector<1x32xf32> to vector<8x32xf32>
    %132 = arith.addf %130, %131 : vector<8x32xf32>
    %133 = arith.addf %121, %132 : vector<8x32xf32>
    %cst_71 = arith.constant dense<0.000000e+00> : vector<8xf32>
    %134 = vector.multi_reduction <add>, %133, %cst_71 [1] : vector<8x32xf32> to vector<8xf32>
    %135 = vector.shape_cast %134 : vector<8xf32> to vector<8x1xf32>
    %cst_72 = arith.constant 3.200000e+01 : f32
    %136 = vector.broadcast %cst_72 : f32 to vector<8x1xf32>
    %137 = arith.divf %135, %136 : vector<8x1xf32>
    %138 = vector.broadcast %137 : vector<8x1xf32> to vector<8x32xf32>
    %139 = arith.subf %133, %138 : vector<8x32xf32>
    %140 = arith.mulf %139, %139 : vector<8x32xf32>
    %cst_73 = arith.constant dense<0.000000e+00> : vector<8xf32>
    %141 = vector.multi_reduction <add>, %140, %cst_73 [1] : vector<8x32xf32> to vector<8xf32>
    %142 = vector.shape_cast %141 : vector<8xf32> to vector<8x1xf32>
    %cst_74 = arith.constant 3.200000e+01 : f32
    %143 = vector.broadcast %cst_74 : f32 to vector<8x1xf32>
    %144 = arith.divf %142, %143 : vector<8x1xf32>
    %145 = vector.broadcast %137 : vector<8x1xf32> to vector<8x32xf32>
    %146 = arith.subf %133, %145 : vector<8x32xf32>
    %cst_75 = arith.constant 9.99999974E-6 : f32
    %147 = vector.broadcast %cst_75 : f32 to vector<8x1xf32>
    %148 = arith.addf %144, %147 : vector<8x1xf32>
    %149 = math.rsqrt %148 : vector<8x1xf32>
    %150 = vector.broadcast %149 : vector<8x1xf32> to vector<8x32xf32>
    %151 = arith.mulf %146, %150 : vector<8x32xf32>
    %152 = vector.broadcast %93 : vector<1x32xf32> to vector<8x32xf32>
    %153 = arith.mulf %151, %152 : vector<8x32xf32>
    %154 = vector.broadcast %94 : vector<1x32xf32> to vector<8x32xf32>
    %155 = arith.addf %153, %154 : vector<8x32xf32>
    %c0_76 = arith.constant 0 : index
    %c0_77 = arith.constant 0 : index
    %c0_78 = arith.constant 0 : index
    %156 = vector.load %arg13[%c0_76, %c0_77, %c0_78] : memref<1x8x32xf32, #tpu.memory_space<vmem>>, vector<1x8x32xf32>
    %157 = vector.shape_cast %156 : vector<1x8x32xf32> to vector<8x32xf32>
    %158 = vector.shape_cast %155 : vector<8x32xf32> to vector<1x8x32xf32>
    tpu.vector_store %arg13[%c0_76, %c0_77, %c0_78], %158 {strides = array<i32>} : memref<1x8x32xf32, #tpu.memory_space<vmem>>, vector<1x8x32xf32>,
    return
  }
  func.func @transform_0(%arg0: i32, %arg1: i32) -> (i32, i32, i32) {
    %c0_i32 = arith.constant 0 : i32
    %c0_i32_0 = arith.constant 0 : i32
    return %arg0, %arg1, %c0_i32 : i32, i32, i32
  }
  func.func @transform_1(%arg0: i32, %arg1: i32) -> (i32, i32, i32) {
    %c0_i32 = arith.constant 0 : i32
    %c0_i32_0 = arith.constant 0 : i32
    %c0_i32_1 = arith.constant 0 : i32
    return %arg0, %c0_i32, %c0_i32_0 : i32, i32, i32
  }
  func.func @transform_2(%arg0: i32, %arg1: i32) -> (i32, i32) {
    %c0_i32 = arith.constant 0 : i32
    %c0_i32_0 = arith.constant 0 : i32
    %c0_i32_1 = arith.constant 0 : i32
    return %c0_i32, %c0_i32_0 : i32, i32
  }
  func.func @transform_3(%arg0: i32, %arg1: i32) -> (i32, i32) {
    %c0_i32 = arith.constant 0 : i32
    %c0_i32_0 = arith.constant 0 : i32
    %c0_i32_1 = arith.constant 0 : i32
    return %c0_i32, %c0_i32_0 : i32, i32
  }
  func.func @transform_4(%arg0: i32, %arg1: i32) -> (i32, i32) {
    %c0_i32 = arith.constant 0 : i32
    %c0_i32_0 = arith.constant 0 : i32
    %c0_i32_1 = arith.constant 0 : i32
    return %c0_i32, %c0_i32_0 : i32, i32
  }
  func.func @transform_5(%arg0: i32, %arg1: i32) -> (i32, i32) {
    %c0_i32 = arith.constant 0 : i32
    %c0_i32_0 = arith.constant 0 : i32
    %c0_i32_1 = arith.constant 0 : i32
    return %c0_i32, %c0_i32_0 : i32, i32
  }
  func.func @transform_6(%arg0: i32, %arg1: i32) -> (i32, i32) {
    %c0_i32 = arith.constant 0 : i32
    %c0_i32_0 = arith.constant 0 : i32
    %c0_i32_1 = arith.constant 0 : i32
    return %c0_i32, %c0_i32_0 : i32, i32
  }
  func.func @transform_7(%arg0: i32, %arg1: i32) -> (i32, i32) {
    %c0_i32 = arith.constant 0 : i32
    %c0_i32_0 = arith.constant 0 : i32
    %c0_i32_1 = arith.constant 0 : i32
    return %c0_i32, %c0_i32_0 : i32, i32
  }
  func.func @transform_8(%arg0: i32, %arg1: i32) -> (i32, i32) {
    %c0_i32 = arith.constant 0 : i32
    %c0_i32_0 = arith.constant 0 : i32
    %c0_i32_1 = arith.constant 0 : i32
    return %c0_i32, %c0_i32_0 : i32, i32
  }
  func.func @transform_9(%arg0: i32, %arg1: i32) -> (i32, i32) {
    %c0_i32 = arith.constant 0 : i32
    %c0_i32_0 = arith.constant 0 : i32
    %c0_i32_1 = arith.constant 0 : i32
    return %c0_i32, %c0_i32_0 : i32, i32
  }
  func.func @transform_10(%arg0: i32, %arg1: i32) -> (i32, i32) {
    %c0_i32 = arith.constant 0 : i32
    %c0_i32_0 = arith.constant 0 : i32
    %c0_i32_1 = arith.constant 0 : i32
    return %c0_i32, %c0_i32_0 : i32, i32
  }
  func.func @transform_11(%arg0: i32, %arg1: i32) -> (i32, i32, i32) {
    %c0_i32 = arith.constant 0 : i32
    %c0_i32_0 = arith.constant 0 : i32
    return %arg0, %arg1, %c0_i32 : i32, i32, i32
  }
  func.func @transform_12(%arg0: i32, %arg1: i32) -> (i32, i32, i32, i32) {
    %c0_i32 = arith.constant 0 : i32
    %c0_i32_0 = arith.constant 0 : i32
    %c0_i32_1 = arith.constant 0 : i32
    return %arg0, %c0_i32, %arg1, %c0_i32_0 : i32, i32, i32, i32
  }
}

</mosaic_0001>

<bundles_post_ra>
// kernel: tpu_custom_call.1
= control target key start
LH: loop header
LB: loop body
LE: loop exit
PB: predicated region body
PF: predicated region fallthrough
CT: control target
= control target key end

     0   :  { %s2012_s0 = inlined_call_operand.vmem [shape: f32[2,8,32], index: 0, kind: input, shape index: {}]   ;;  %s2013_s1 = inlined_call_operand.vmem [shape: f32[2,8,32], index: 1, kind: input, shape index: {}]   ;;  %s2014_s2 = inlined_call_operand.vmem [shape: f32[32,32], index: 2, kind: input, shape index: {}]   ;;  %s2015_s3 = inlined_call_operand.vmem [shape: f32[1,32], index: 3, kind: input, shape index: {}]   ;;  %s2016_s4 = inlined_call_operand.vmem [shape: f32[32,64], index: 4, kind: input, shape index: {}]   ;;  %s2017_s5 = inlined_call_operand.hbm [shape: f32[1,64], index: 5, kind: input, shape index: {}]   ;;  %s2018_s6 = inlined_call_operand.vmem [shape: f32[32,32], index: 6, kind: input, shape index: {}]   ;;  %s2019_s7 = inlined_call_operand.vmem [shape: f32[32,128], index: 7, kind: input, shape index: {}]   ;;  %s2020_s8 = inlined_call_operand.hbm [shape: f32[1,128], index: 8, kind: input, shape index: {}]   ;;  %s2021_s9 = inlined_call_operand.vmem [shape: f32[128,32], index: 9, kind: input, shape index: {}]   ;;  %s2022_s10 = inlined_call_operand.vmem [shape: f32[6,32], index: 10, kind: input, shape index: {}]   ;;  %s2023_s11 = inlined_call_operand.hbm [shape: f32[2,8,32], index: 11, kind: output, shape index: {0}]   ;;  %s2024_s12 = inlined_call_operand.hbm [shape: f32[2,4,8,8], index: 12, kind: output, shape index: {1}]  }
   0x1   :  { %2029 = sst [smem:[#allocation20_spill]] %s2012_s0 }
   0x2   :  { %2030 = sst [smem:[#allocation21_spill]] %s2013_s1 }
   0x3   :  { %2031 = sst [smem:[#allocation22_spill]] %s2014_s2 }
   0x4   :  { %2032 = sst [smem:[#allocation23_spill]] %s2017_s5 }
   0x5   :  { %18 = vsyncpa [#allocation5], 0 }
   0x6   :  { %19 = vsyncpa [#allocation8], 0 }
   0x7   :  { %20 = vsyncpa [#allocation6], 0 }
   0x8   :  { %22 = vsyncpa [#allocation6 + $0x1], 0 }
   0x9   :  { %23 = vsyncpa [#allocation11], 0 }
   0xa   :  { %25 = vsyncpa [#allocation11 + $0x1], 0  ;;  %s1671_s21 = smov 0   ;;  %s1673_s22 = smov 0  }
   0xb   :  { %s1675_s23 = smov 0   ;;  %s1677_s24 = smov 0  }
   0xc   :  { %s1679_s25 = smov 0   ;;  %s1681_s26 = smov 0  }
   0xd LB: > { %2033 = sst [smem:[#allocation16_spill]] %s1581_s23  ;;  %s1254_s27 = sadd.s32 4294967295, %s1593_s26   ;;  %s1593_s26 = sphi %s1681_s26, %s31_s26   ;;  %s1589_s25 = sphi %s1679_s25, %s2049_s25   ;;  %s1585_s24 = sphi %s1677_s24, %s2048_s24   ;;  %s1581_s23 = sphi %s1675_s23, %s2047_s23   ;;  %s1577_s22 = sphi %s1673_s22, %s2051_s22   ;;  %s1573_s21 = sphi %s1671_s21, %s2050_s21  }
   0xe   : > { %2034 = sst [smem:[#allocation17_spill]] %s1589_s25  ;;  %s1255_s28 = sadd.s32 4294967294, %s1593_s26  }
   0xf   : > { %s43_s29 = sadd.s32 1, %s1589_s25  ;;  %s295_s30 = sadd.s32 1, %s1581_s23 }
  0x10   : > { %p45_p0 = scmp.ge.s32.totalorder %s43_s29, 2  ;;  %p305_p1 = scmp.ne.s32.totalorder %s1581_s23, %s1577_s22 }
  0x11   : > { %p306_p2 = scmp.eq.s32.totalorder %s1254_s27, 1  ;;  %p311_p3 = scmp.ne.s32.totalorder %s1577_s22, %s1573_s21 }
  0x12   : > { %s2053_s29 = smov (%p45_p0, %s43_s29), 0  ;;  %p312_p5 = scmp.eq.s32.totalorder %s1255_s28, 1 }
  0x13   : > { %2035 = sst [smem:[#allocation18_spill]] %s2053_s29  ;;  %p1711_p4 = por %p306_p2, %p305_p1 }
  0x14   : > { %s290_s14 = ssub.s32 %s1589_s25, %s2053_s29  ;;  %p1256_p6 = scmp.ge.s32.totalorder %s1593_s26, 1 }
  0x15   : > { %p293_p7 = scmp.eq.s32.totalorder %s290_s14, 0  ;;  %p1718_p8 = por %p312_p5, %p311_p3 }
  0x16   : > { %p347_p9 = scmp.lt.s32.totalorder %s1593_s26, 3  ;;  %p1730_p11 = scmp.eq.s32.totalorder %s1254_s27, 0 }
  0x17   : > { %s1724_s16 = scalar_select %p293_p7, %s1581_s23, %s295_s30  }
  0x18   : > { %p1726_p10 = pnand %p1256_p6, %p347_p9  ;;  %s2041_s5 = sld [smem:[#allocation23_spill]] }
  0x19   : > { %2038 = sst [smem:[#allocation19_spill]] %s1724_s16  ;;  %s1595_s14 = smov [#allocation4]  }
  0x1a   : > { %p1306_p12 = pneg %p1726_p10  ;;  %s370_s30 = sshll.u32 %s1595_s14, 4  ;;  %s371_s30 = int_to_ptr.vmem [resolvable:$true] %s370_s30 }
  0x1b   : > { %s386_s16 = sshll.u32 %s2020_s8, 4  ;;  %s1596_s27 = smov [#allocation7]   ;;  %s387_s16 = int_to_ptr.hbm [resolvable:$true] %s386_s16 }
  0x1c   : > { %p1307_p13 = pnand %p1730_p11, %p1306_p12  ;;  %s388_s23 = sshll.u32 %s1596_s27, 4  ;;  %s389_s23 = int_to_ptr.vmem [resolvable:$true] %s388_s23 }
  0x1d   : > { %424 = sbr.rel (%p1726_p10) target bundleno = 1909 (0x775), region = 64 }
  0x1e   : > { %s368_s28 = sshll.u32 %s2041_s5, 4  ;;  %s369_s28 = int_to_ptr.hbm [resolvable:$true] %s368_s28 }
  0x1f   : > { %1309 = dma.hbm_to_vmem [thread:$0]  (!%p1307_p13), %s369_s28, 16, %s371_s30, [#allocation5]  }
  0x20   : > { %1312 = dma.hbm_to_vmem [thread:$0]  (!%p1307_p13), %s387_s16, 16, %s389_s23, [#allocation8]  }
  0x22   : > { %1556 = dma.done.wait (%p1730_p11), [#allocation5], 16  }
  0x23   : > { %1558 = vsyncadd (%p1730_p11), [#allocation5], 4294967280 }
  0x24   : > { %1560 = dma.done.wait (%p1730_p11), [#allocation8], 16  }
  0x25   : > { %1562 = vsyncadd (%p1730_p11), [#allocation8], 4294967280  ;;  %p483_p0 = scmp.lt.s32.totalorder %s1585_s24, 1  ;;  %v502_v0 = vld [vmem:[%s2016_s4 + $0x18] sm:$0xff]  ;;  %v501_v1 = vld [vmem:[%s2016_s4 + $0x10] sm:$0xff]  ;;  %s2042_s1 = sld [smem:[#allocation21_spill]] }
  0x26   : > { %523 = vmatpush.msra.mxu0 %v502_v0  ;;  %s2043_s2 = sld [smem:[#allocation22_spill]]  ;;  %v500_v3 = vld [vmem:[%s2016_s4 + $0x8] sm:$0xff]  ;;  %v499_v4 = vld [vmem:[%s2016_s4] sm:$0xff]  ;;  %vm507_vm0 = vcmask 261120   ;;  %v1384_v10 = vld [vmem:[#allocation4] ss:$0 sm:$0xff] }
  0x27   : > { %s484_s25 = scalar_select %p483_p0, %s1585_s24, 1  ;;  %v1385_v13 = vld [vmem:[%s2015_s3] ss:$0 sm:$0xff]  ;;  %vm572_vm1 = vcmask 64512  }
  0x28   : > { %524 = vmatpush.msra.mxu0 %v501_v1  ;;  %s2044_s0 = sld [smem:[#allocation20_spill]]  ;;  %s1598_s29 = smov 112  }
  0x29   : > { %s1265_s23 = sshll.u32 %s484_s25, 3  ;;  %s1599_s16 = smov 120  }
  0x2a   : > { %525 = vmatpush.msra.mxu0 %v500_v3  ;;  %s1600_s17 = smov 96   ;;  %s1829_s19 = sand.u32 1, %s1577_s22  }
  0x2b   : > { %s493_s14 = scalar_lea.vmem %s2042_s1, %s1265_s23  ;;  %s1264_s20 = sshll.u32 %s1829_s19, 5 }
  0x2c   : > { %v541_v2 = vld [vmem:[%s2043_s2 + $0x18] sm:$0xff]  ;;  %v540_v5 = vld [vmem:[%s2043_s2 + $0x10] sm:$0xff]  ;;  %v498_v6 = vld [vmem:[%s493_s14] sm:$0xff]  ;;  %526 = vmatpush.msra.mxu0 %v499_v4  ;;  %s1833_s28 = scalar_lea.vmem [#allocation10], %s1264_s20  ;;  %s2028_s18 = smov 8  }
  0x2d   : > { %562 = vmatpush.msra.mxu1 %v541_v2  ;;  %v539_v7 = vld [vmem:[%s2043_s2 + $0x8] sm:$0xff]  ;;  %v538_v8 = vld [vmem:[%s2043_s2] sm:$0xff]  ;;  %1267 = vmatmul.msk.f32.vlgmr.msra.gmra.mxu0 %vm507_vm0, %v498_v6  ;;  %s1602_s5 = smov 16   ;;  %s1603_s30 = smov 24  }
  0x2e   : > { %s489_s27 = scalar_lea.vmem %s2044_s0, %s1265_s23  ;;  %s1597_s23 = smov 104  }
  0x2f   : > { %563 = vmatpush.msra.mxu1 %v540_v5  ;;  %v1786_v9 = vld [vmem:[%s489_s27] sm:$0xff]  ;;  %s1108_s27 = sshll.u32 %s1833_s28, 4  ;;  %s1080_s25 = scalar_lea.sflag [#allocation11], %s1829_s19  ;;  %s1109_s27 = int_to_ptr.vmem [resolvable:$true] %s1108_s27 }
  0x30   : > { %s1495_s0 = scalar_lea.hbm %s2024_s12, 64 }
  0x31   : > { %564 = vmatpush.msra.mxu1 %v539_v7 }
  0x33   : > { %565 = vmatpush.msra.mxu1 %v538_v8 }
  0x34   : > { %1268 = vmatmul.msk.f32.vlgmr.msra.gmra.mxu1 %vm507_vm0, %v1786_v9 }
  0xaa   : > { %v528_v11 = vpop.f32.mrf.mxu0 }
  0xab   : > { %v529_v12 = vadd.f32 %v1384_v10, %v528_v11 }
  0xad   : > { %531 = vst.msk [vmem:[#allocation2] sm:$0xff] %vm507_vm0, %v529_v12 }
  0xb1   : > { %v567_v14 = vpop.f32.mrf.mxu1 }
  0xb2   : > { %v568_v16 = vadd.f32 %v1385_v13, %v567_v14 }
  0xb4   : > { %v570_v15 = vld [vmem:[#allocation2] sm:$0xff] }
  0xb5   : > { %813 = vrot.lane.b32.xlu2 %v570_v15, %s1597_s23  ;;  %732 = vrot.lane.b32.xlu1 %v570_v15, %s1598_s29 }
  0xb6   : > { %650 = vrot.lane.b32.xlu0 %v570_v15, %s1599_s16  ;;  %1269 = vmatpush.xpose.msk.msra.mxu2 %vm572_vm1, %v570_v15 }
  0xb9   : > { %1270 = vmatmul.msk.f32.vlgmr.msra.gmra.mxu2 %vm572_vm1, %v568_v16 }
  0xbd   : > { %811 = vrot.lane.b32.xlu2 %v568_v16, %s1597_s23  ;;  %730 = vrot.lane.b32.xlu1 %v568_v16, %s1598_s29 }
  0xbe   : > { %648 = vrot.lane.b32.xlu0 %v568_v16, %s1599_s16 }
 0x10f   : > { %v814_v18 = vpop.permute.xlu2 %813 }
 0x117   : > { %v812_v22 = vpop.permute.xlu2 %811 }
 0x127   : > { %v733_v17 = vpop.permute.xlu1 %732 }
 0x128   : > { %v651_v19 = vpop.permute.xlu0 %650  ;;  %1276 = vmatpush.xpose.msk.msrb.mxu0 %vm572_vm1, %v733_v17 }
 0x129   : > { %1272 = vmatpush.xpose.msk.msrb.mxu2 %vm572_vm1, %v651_v19 }
 0x12c   : > { %1280 = vmatpush.xpose.msk.msra.mxu0 %vm572_vm1, %v814_v18 }
 0x12f   : > { %v731_v20 = vpop.permute.xlu1 %730 }
 0x130   : > { %v649_v21 = vpop.permute.xlu0 %648  ;;  %1277 = vmatmul.msk.f32.vlgmr.msrb.gmra.mxu0 %vm572_vm1, %v731_v20 }
 0x131   : > { %1273 = vmatmul.msk.f32.vlgmr.msrb.gmra.mxu2 %vm572_vm1, %v649_v21 }
 0x138   : > { %1281 = vmatmul.msk.f32.vlgmr.msra.gmra.mxu0 %vm572_vm1, %v812_v22 }
 0x13c   : > { %v596_v23 = vpop.f32.mrf.mxu2 }
 0x13d   : > { %v599_v24 = vmul.f32 0.35355338, %v596_v23 }
 0x13f   : > { %v600_v25 = vsel %vm572_vm1, %v599_v24, -inf }
 0x140   : > { %601 = vmax.xlane.f32.xlu1 %v600_v25 }
 0x1ad   : > { %v755_v26 = vpop.f32.mrf.mxu0 }
 0x1ae   : > { %v758_v36 = vmul.f32 0.35355338, %v755_v26 }
 0x1b0   : > { %v759_v37 = vsel %vm572_vm1, %v758_v36, -inf }
 0x1b3   : > { %v602_v27 = vpop.xlane.xlu1 %601 }
 0x1b4   : > { %v673_v28 = vpop.f32.mrf.mxu2  ;;  %v603_v32 = vsub.f32 %v599_v24, %v602_v27 }
 0x1b5   : > { %v676_v29 = vmul.f32 0.35355338, %v673_v28  ;;  %v836_v30 = vpop.f32.mrf.mxu0 }
 0x1b6   : > { %v839_v31 = vmul.f32 0.35355338, %v836_v30  ;;  %v604_v35 = vmul.f32 1.442695, %v603_v32 }
 0x1b7   : > { %v677_v33 = vsel %vm572_vm1, %v676_v29, -inf }
 0x1b8   : > { %678 = vmax.xlane.f32.xlu0 %v677_v33  ;;  %v840_v34 = vsel %vm572_vm1, %v839_v31, -inf  ;;  %1393 = vpow2.f32 %v604_v35 }
 0x1b9   : > { %841 = vmax.xlane.f32.xlu2 %v840_v34 }
 0x1be   : > { %v1394_v38 = vpop.eup %1393 }
 0x1bf   : > { %v606_v39 = vsel %vm572_vm1, %v1394_v38, 0.0 }
 0x1c1   : > { %760 = vmax.xlane.f32.xlu2 %v759_v37 }
 0x1c9   : > { %607 = vadd.xlane.f32.xlu2 %v606_v39 }
 0x1cc   : > { %533 = vrot.lane.b32.xlu0 %v529_v12, %s1600_s17  ;;  %s1293_s17 = sshll.u32 %s1585_s24, 5 }
 0x22b   : > { %v679_v40 = vpop.xlane.xlu0 %678 }
 0x22c   : > { %v680_v41 = vsub.f32 %v676_v29, %v679_v40  ;;  %v842_v42 = vpop.xlane.xlu2 %841 }
 0x22d   : > { %v843_v44 = vsub.f32 %v839_v31, %v842_v42 }
 0x22e   : > { %v681_v43 = vmul.f32 1.442695, %v680_v41 }
 0x22f   : > { %v844_v45 = vmul.f32 1.442695, %v843_v44 }
 0x230   : > { %1395 = vpow2.f32 %v681_v43 }
 0x231   : > { %1397 = vpow2.f32 %v844_v45 }
 0x234   : > { %v761_v46 = vpop.xlane.xlu2 %760 }
 0x235   : > { %v762_v47 = vsub.f32 %v758_v36, %v761_v46 }
 0x236   : > { %v1814_v48 = vpop.eup %1395 }
 0x237   : > { %v763_v49 = vmul.f32 1.442695, %v762_v47  ;;  %v683_v50 = vsel %vm572_vm1, %v1814_v48, 0.0  ;;  %v1818_v51 = vpop.eup %1397 }
 0x238   : > { %684 = vadd.xlane.f32.xlu1 %v683_v50  ;;  %v846_v55 = vsel %vm572_vm1, %v1818_v51, 0.0  ;;  %v917_v50 = vld [vmem:[%s2018_s6 + $0x10] sm:$0xff] }
 0x239   : > { %1399 = vpow2.f32 %v763_v49  ;;  %v918_v49 = vld [vmem:[%s2018_s6 + $0x18] sm:$0xff] }
 0x23a   : > { %935 = vmatpush.msrb.mxu0 %v918_v49 }
 0x23c   : > { %v608_v52 = vpop.xlane.xlu2 %607  ;;  %936 = vmatpush.msrb.mxu0 %v917_v50 }
 0x23d   : > { %1401 = vrcp.f32 %v608_v52  ;;  %v620_v61 = vand.u32 2147483648, %v608_v52  ;;  %v618_v63 = vand.u32 2147483647, %v608_v52  ;;  %vm614_vm3 = vweird.f32 %v608_v52 }
 0x23e   : > { %v534_v53 = vpop.permute.xlu0 %533 }
 0x23f   : > { %v1820_v54 = vpop.eup %1399  ;;  %536 = vst.msk [vmem:[#allocation3] sm:$0xff] %vm507_vm0, %v534_v53  ;;  %v621_v1 = vor.u32 1.1754944e-38, %v620_v61  ;;  %vm619_vm5 = vcmp.eq.f32.partialorder %v618_v63, 8.507059e+37 }
 0x240   : > { %847 = vadd.xlane.f32.xlu1 %v846_v55  ;;  %v765_v56 = vsel %vm572_vm1, %v1820_v54, 0.0 }
 0x241   : > { %766 = vadd.xlane.f32.xlu2 %v765_v56 }
 0x243   : > { %v1402_v57 = vpop.eup %1401 }
 0x244   : > { %v610_v58 = vmul.f32 %v1402_v57, %v608_v52  ;;  %vm615_vm2 = vweird.f32 %v1402_v57  ;;  %v915_v52 = vld [vmem:[%s2018_s6] sm:$0xff] }
 0x245   : > { %vm616_vm4 = vmor %vm614_vm3, %vm615_vm2 }
 0x246   : > { %v611_v59 = vsub.f32 1.0, %v610_v58  ;;  %v571_v60 = vld [vmem:[#allocation3] sm:$0xff] }
 0x247   : > { %866 = vrot.lane.b32.xlu0 %v571_v60, %s1597_s23  ;;  %643 = vmatpush.msrb.mxu1 %v571_v60 }
 0x248   : > { %v612_v62 = vmul.f32 %v1402_v57, %v611_v59  ;;  %v1386_v59 = vld [vmem:[%s2022_s10] ss:$0 sm:$0xff] }
 0x24a   : > { %v613_v0 = vadd.f32 %v1402_v57, %v612_v62 }
 0x24c   : > { %v617_v2 = vsel %vm616_vm4, %v1402_v57, %v613_v0  ;;  %vm905_vm4 = vcmask 130048   ;;  %v1604_v0 = vmov 32.0  }
 0x24d   : > { %v622_v3 = vsel %vm619_vm5, %v621_v1, %v617_v2  ;;  %vm907_vm5 = vcmask 195584  }
 0x24e   : > { %v623_v4 = vmul.f32 %v1394_v38, %v622_v3 }
 0x250   : > { %1271 = vmatmul.msk.f32.vlgmr.msrb.gmra.mxu1 %vm572_vm1, %v623_v4  ;;  %624 = vst.msk [vmem:[%s1833_s28] sm:$0xff] %vm572_vm1, %v623_v4 }
 0x259   : > { %704 = vrot.lane.b32.xlu1 %v571_v60, %s1599_s16  ;;  %785 = vrot.lane.b32.xlu2 %v571_v60, %s1598_s29 }
 0x2ab   : > { %v685_v5 = vpop.xlane.xlu1 %684 }
 0x2ac   : > { %1403 = vrcp.f32 %v685_v5  ;;  %v697_v12 = vand.u32 2147483648, %v685_v5  ;;  %v695_v14 = vand.u32 2147483647, %v685_v5  ;;  %vm691_vm7 = vweird.f32 %v685_v5 }
 0x2ae   : > { %v698_v17 = vor.u32 1.1754944e-38, %v697_v12  ;;  %vm696_vm9 = vcmp.eq.f32.partialorder %v695_v14, 8.507059e+37  ;;  %v980_v12 = vld [vmem:[%s2019_s7 + $0x18] sm:$0xff]  ;;  %v978_v14 = vld [vmem:[%s2019_s7 + $0x8] sm:$0xff] }
 0x2b2   : > { %v1404_v6 = vpop.eup %1403 }
 0x2b3   : > { %v687_v7 = vmul.f32 %v1404_v6, %v685_v5  ;;  %v848_v8 = vpop.xlane.xlu1 %847  ;;  %vm692_vm6 = vweird.f32 %v1404_v6 }
 0x2b4   : > { %1405 = vrcp.f32 %v848_v8  ;;  %v767_v10 = vpop.xlane.xlu2 %766  ;;  %vm693_vm8 = vmor %vm691_vm7, %vm692_vm6  ;;  %v860_v26 = vand.u32 2147483648, %v848_v8  ;;  %v858_v29 = vand.u32 2147483647, %v848_v8  ;;  %vm854_vm12 = vweird.f32 %v848_v8 }
 0x2b5   : > { %v688_v11 = vsub.f32 1.0, %v687_v7  ;;  %1407 = vrcp.f32 %v767_v10  ;;  %v779_v30 = vand.u32 2147483648, %v767_v10  ;;  %v777_v32 = vand.u32 2147483647, %v767_v10 }
 0x2b6   : > { %v861_v34 = vor.u32 1.1754944e-38, %v860_v26  ;;  %vm773_vm14 = vweird.f32 %v767_v10  ;;  %vm859_vm15 = vcmp.eq.f32.partialorder %v858_v29, 8.507059e+37  ;;  %1409 = vrcp.f32 %v1604_v0  ;;  %v1017_v26 = vld [vmem:[%s2021_s9 + $0x40] sm:$0xff] }
 0x2b7   : > { %v689_v13 = vmul.f32 %v1404_v6, %v688_v11  ;;  %v780_v37 = vor.u32 1.1754944e-38, %v779_v30  ;;  %vm778_vm3 = vcmp.eq.f32.partialorder %v777_v32, 8.507059e+37  ;;  %v1015_v30 = vld [vmem:[%s2021_s9 + $0x30] sm:$0xff]  ;;  %v1014_v32 = vld [vmem:[%s2021_s9 + $0x28] sm:$0xff] }
 0x2b9   : > { %v690_v15 = vadd.f32 %v1404_v6, %v689_v13  ;;  %v867_v44 = vpop.permute.xlu0 %866  ;;  %v979_v13 = vld [vmem:[%s2019_s7 + $0x10] sm:$0xff] }
 0x2ba   : > { %v1406_v16 = vpop.eup %1405 }
 0x2bb   : > { %v1408_v18 = vpop.eup %1407  ;;  %v694_v19 = vsel %vm693_vm8, %v1404_v6, %v690_v15  ;;  %v850_v20 = vmul.f32 %v1406_v16, %v848_v8  ;;  %vm855_vm10 = vweird.f32 %v1406_v16  ;;  %v977_v15 = vld [vmem:[%s2019_s7] sm:$0xff] }
 0x2bc   : > { %v699_v21 = vsel %vm696_vm9, %v698_v17, %v694_v19  ;;  %v769_v22 = vmul.f32 %v1408_v18, %v767_v10  ;;  %v786_v23 = vpop.permute.xlu2 %785  ;;  %vm774_vm11 = vweird.f32 %v1408_v18  ;;  %vm856_vm13 = vmor %vm854_vm12, %vm855_vm10  ;;  %v1410_v1 = vpop.eup %1409  ;;  %v1023_v17 = vld [vmem:[%s2021_s9 + $0x70] sm:$0xff] }
 0x2bd   : > { %v851_v24 = vsub.f32 1.0, %v850_v20  ;;  %806 = vmatpush.msra.mxu1 %v786_v23  ;;  %v700_v25 = vmul.f32 %v1814_v48, %v699_v21  ;;  %vm775_vm2 = vmor %vm773_vm14, %vm774_vm11  ;;  %v948_v2 = vmul.f32 32.0, %v1410_v1  ;;  %v1021_v21 = vld [vmem:[%s2021_s9 + $0x60] sm:$0xff]  ;;  %v1020_v23 = vld [vmem:[%s2021_s9 + $0x58] sm:$0xff] }
 0x2be   : > { %v770_v27 = vsub.f32 1.0, %v769_v22 }
 0x2bf   : > { %v852_v28 = vmul.f32 %v1406_v16, %v851_v24  ;;  %1274 = vst.msk [vmem:[%s1833_s28 + $0x8] sm:$0xff] %vm572_vm1, %v700_v25  ;;  %v949_v3 = vsub.f32 1.0, %v948_v2  ;;  %1000 = vmatpush.msrb.mxu1 %v980_v12  ;;  %v1019_v24 = vld [vmem:[%s2021_s9 + $0x50] sm:$0xff] }
 0x2c0   : > { %v771_v31 = vmul.f32 %v1408_v18, %v770_v27 }
 0x2c1   : > { %v853_v33 = vadd.f32 %v1406_v16, %v852_v28  ;;  %v950_v4 = vmul.f32 %v1410_v1, %v949_v3  ;;  %1001 = vmatpush.msrb.mxu1 %v979_v13  ;;  %v1016_v28 = vld [vmem:[%s2021_s9 + $0x38] sm:$0xff] }
 0x2c2   : > { %v772_v35 = vadd.f32 %v1408_v18, %v771_v31 }
 0x2c3   : > { %v857_v36 = vsel %vm856_vm13, %v1406_v16, %v853_v33  ;;  %v951_v5 = vadd.f32 %v1410_v1, %v950_v4  ;;  %1002 = vmatpush.msrb.mxu1 %v978_v14  ;;  %v1024_v16 = vld [vmem:[%s2021_s9 + $0x78] sm:$0xff] }
 0x2c4   : > { %v862_v38 = vsel %vm859_vm15, %v861_v34, %v857_v36  ;;  %v776_v39 = vsel %vm775_vm2, %v1408_v18, %v772_v35  ;;  %1026 = vmatpush.msra.mxu3 %v1024_v16  ;;  %v1022_v18 = vld [vmem:[%s2021_s9 + $0x68] sm:$0xff]  ;;  %v1013_v34 = vld [vmem:[%s2021_s9 + $0x20] sm:$0xff]  ;;  %v1012_v36 = vld [vmem:[%s2021_s9 + $0x18] sm:$0xff] }
 0x2c5   : > { %v781_v40 = vsel %vm778_vm3, %v780_v37, %v776_v39  ;;  %v863_v41 = vmul.f32 %v1818_v51, %v862_v38  ;;  %v916_v51 = vld [vmem:[%s2018_s6 + $0x8] sm:$0xff]  ;;  %1003 = vmatpush.msrb.mxu1 %v977_v15  ;;  %v1387_v38 = vld [vmem:[%s2022_s10 + $0x1] ss:$0 sm:$0xff] }
 0x2c6   : > { %v782_v42 = vmul.f32 %v1820_v54, %v781_v40  ;;  %937 = vmatpush.msrb.mxu0 %v916_v51  ;;  %1027 = vmatpush.msra.mxu3 %v1023_v17  ;;  %v1390_v51 = vld [vmem:[%s2022_s10 + $0x3] ss:$0 sm:$0xff] }
 0x2c7   : > { %1282 = vst.msk [vmem:[%s1833_s28 + $0x18] sm:$0xff] %vm572_vm1, %v863_v41 }
 0x2c8   : > { %1279 = vmatmul.msk.f32.vlgmr.msra.gmra.mxu1 %vm572_vm1, %v782_v42  ;;  %1278 = vst.msk [vmem:[%s1833_s28 + $0x10] sm:$0xff] %vm572_vm1, %v782_v42  ;;  %938 = vmatpush.msrb.mxu0 %v915_v52 }
 0x2c9   : > { %1028 = vmatpush.msra.mxu3 %v1022_v18 }
 0x2cb   : > { %v705_v43 = vpop.permute.xlu1 %704  ;;  %1029 = vmatpush.msra.mxu3 %v1021_v21 }
 0x2cc   : > { %725 = vmatpush.msra.mxu2 %v705_v43 }
 0x2cd   : > { %1275 = vmatmul.msk.f32.vlgmr.msra.gmra.mxu2 %vm572_vm1, %v700_v25  ;;  %v645_v45 = vpop.f32.mrf.mxu1  ;;  %1030 = vmatpush.msra.mxu3 %v1020_v23  ;;  %v1018_v25 = vld [vmem:[%s2021_s9 + $0x48] sm:$0xff] }
 0x2ce   : > { %887 = vmatpush.msrb.mxu2 %v867_v44  ;;  %v1011_v44 = vld [vmem:[%s2021_s9 + $0x10] sm:$0xff] }
 0x2cf   : > { %1031 = vmatpush.msra.mxu3 %v1019_v24 }
 0x2d1   : > { %1032 = vmatpush.msra.mxu3 %v1018_v25 }
 0x2d3   : > { %1033 = vmatpush.msra.mxu3 %v1017_v26 }
 0x2d5   : > { %1283 = vmatmul.msk.f32.vlgmr.msrb.gmra.mxu2 %vm572_vm1, %v863_v41  ;;  %1034 = vmatpush.msra.mxu3 %v1016_v28  ;;  %v1388_v41 = vld [vmem:[%s2022_s10 + $0x2] ss:$0 sm:$0xff] }
 0x2d7   : > { %1035 = vmatpush.msra.mxu3 %v1015_v30 }
 0x2d9   : > { %1036 = vmatpush.msra.mxu3 %v1014_v32 }
 0x2db   : > { %1037 = vmatpush.msra.mxu3 %v1013_v34 }
 0x2dd   : > { %1038 = vmatpush.msra.mxu3 %v1012_v36 }
 0x2df   : > { %1039 = vmatpush.msra.mxu3 %v1011_v44 }
 0x345   : > { %v808_v47 = vpop.f32.mrf.mxu1 }
 0x350   : > { %v727_v46 = vpop.f32.mrf.mxu2 }
 0x351   : > { %893 = vrot.lane.b32.xlu0 %v727_v46, %s2028_s18  ;;  %v1009_v46 = vld [vmem:[%s2021_s9] sm:$0xff] }
 0x358   : > { %v889_v48 = vpop.f32.mrf.mxu2 }
 0x359   : > { %897 = vrot.lane.b32.xlu0 %v808_v47, %s1602_s5  ;;  %901 = vrot.lane.b32.xlu1 %v889_v48, %s1603_s30  ;;  %v1389_v47 = vld [vmem:[#allocation7] ss:$0 sm:$0xff]  ;;  %s1107_s30 = scalar_lea.hbm %s2024_s12, %s1293_s17 }
 0x35a   : > { %s1110_s14 = sshll.u32 %s1107_s30, 4  ;;  %s1111_s14 = int_to_ptr.hbm [resolvable:$true] %s1110_s14 }
 0x35b   : > { %s1489_s23 = sshra.s32 %s1111_s14, 4  ;;  %s1490_s23 = int_to_ptr.hbm [resolvable:$true] %s1489_s23 }
 0x35c   : > { %s1491_s29 = scalar_lea.hbm %s1490_s23, 32  ;;  %p1496_p5 = scmp.lt.s32.totalorder %s1490_s23, %s2024_s12 }
 0x35d   : > { %p1492_p1 = scmp.ne.s32.totalorder %s1490_s23, %s1491_s29  ;;  %p1497_p6 = scmp.lt.s32.totalorder %s1495_s0, %s1491_s29 }
 0x35f   : > { %p1493_p2 = pnand %p1492_p1, %p1711_p4  ;;  %p1498_p7 = por %p1497_p6, %p1496_p5 }
 0x361   : > { %p1494_p3 = pneg %p1493_p2 }
 0x363   : > { %p1499_p9 = pnand %p1498_p7, %p1494_p3 }
 0x3c3   : > { %v894_v53 = vpop.permute.xlu0 %893 }
 0x3c4   : > { %v904_v54 = vsel %vm572_vm1, %v645_v45, %v894_v53  ;;  %vm952_vm1 = vweird.f32 %v1410_v1  ;;  %v1010_v45 = vld [vmem:[%s2021_s9 + $0x8] sm:$0xff] }
 0x3c5   : > { %v1871_v6 = vsel %vm952_vm1, %v1410_v1, %v951_v5  ;;  %1040 = vmatpush.msra.mxu3 %v1010_v45 }
 0x3c7   : > { %1041 = vmatpush.msra.mxu3 %v1009_v46 }
 0x3cb   : > { %v898_v55 = vpop.permute.xlu0 %897  ;;  %v902_v56 = vpop.permute.xlu1 %901 }
 0x3cc   : > { %v906_v57 = vsel %vm905_vm4, %v904_v54, %v898_v55 }
 0x3cd   : > { %v908_v58 = vsel %vm907_vm5, %v906_v57, %v902_v56 }
 0x3ce   : > { %1284 = vmatmul.msk.f32.vlgmr.msrb.gmra.mxu0 %vm507_vm0, %v908_v58 }
 0x44b   : > { %v940_v60 = vpop.f32.mrf.mxu0 }
 0x44c   : > { %v941_v61 = vadd.f32 %v1386_v59, %v940_v60 }
 0x44e   : > { %v943_v62 = vadd.f32 %v941_v61, %v1786_v9 }
 0x450   : > { %v944_v63 = vsel %vm507_vm0, %v943_v62, 0.0 }
 0x451   : > { %945 = vadd.xlane.f32.xlu0 %v944_v63 }
 0x4c4   : > { %v946_v7 = vpop.xlane.xlu0 %945 }
 0x4c5   : > { %v954_v8 = vmul.f32 %v1871_v6, %v946_v7 }
 0x4c7   : > { %v955_v10 = vsub.f32 %v943_v62, %v954_v8 }
 0x4c9   : > { %v956_v11 = vmul.f32 %v955_v10, %v955_v10 }
 0x4cb   : > { %v957_v9 = vsel %vm507_vm0, %v956_v11, 0.0 }
 0x4cc   : > { %958 = vadd.xlane.f32.xlu2 %v957_v9 }
 0x53f   : > { %v959_v19 = vpop.xlane.xlu2 %958 }
 0x540   : > { %v960_v20 = vmul.f32 %v959_v19, %v1871_v6 }
 0x542   : > { %v961_v22 = vadd.f32 1e-05, %v960_v20 }
 0x544   : > { %1411 = vrsqrt.f32 %v961_v22  ;;  %vm968_vm7 = vweird.f32 %v961_v22 }
 0x54a   : > { %v1412_v27 = vpop.eup %1411 }
 0x54b   : > { %v963_v29 = vmul.f32 %v1412_v27, %v961_v22  ;;  %vm969_vm6 = vweird.f32 %v1412_v27 }
 0x54c   : > { %vm970_vm8 = vmor %vm968_vm7, %vm969_vm6 }
 0x54d   : > { %v964_v31 = vmul.f32 %v1412_v27, %v963_v29 }
 0x54f   : > { %v965_v33 = vmul.f32 0.5, %v964_v31 }
 0x551   : > { %v966_v35 = vsub.f32 1.5, %v965_v33 }
 0x553   : > { %v967_v37 = vmul.f32 %v1412_v27, %v966_v35 }
 0x555   : > { %v971_v39 = vsel %vm970_vm8, %v1412_v27, %v967_v37 }
 0x556   : > { %v972_v40 = vmul.f32 %v971_v39, %v955_v10 }
 0x558   : > { %v974_v42 = vmul.f32 %v1387_v38, %v972_v40 }
 0x55a   : > { %v976_v43 = vadd.f32 %v1388_v41, %v974_v42 }
 0x55c   : > { %1285 = vmatmul.msk.f32.vlgmr.msrb.gmra.mxu1 %vm507_vm0, %v976_v43 }
 0x5d9   : > { %v1005_v48 = vpop.f32.mrf.mxu1 }
 0x5da   : > { %v1006_v49 = vadd.f32 %v1389_v47, %v1005_v48 }
 0x5dc   : > { %v1008_v50 = vmax.f32 %v1006_v49, 0.0 }
 0x5de   : > { %1042 = vmatmul.f32.vlgmr.msra.gmra.mxu3 %v1008_v50 }
 0x661   : > { %v1043_v52 = vpop.f32.mrf.mxu3 }
 0x662   : > { %v1044_v53 = vadd.f32 %v1390_v51, %v1043_v52 }
 0x664   : > { %v1046_v54 = vadd.f32 %v1044_v53, %v976_v43 }
 0x666   : > { %v1047_v55 = vsel %vm507_vm0, %v1046_v54, 0.0 }
 0x667   : > { %1048 = vadd.xlane.f32.xlu1 %v1047_v55 }
 0x6da   : > { %v1049_v56 = vpop.xlane.xlu1 %1048 }
 0x6db   : > { %v1050_v57 = vmul.f32 %v1049_v56, %v1871_v6 }
 0x6dd   : > { %v1051_v58 = vsub.f32 %v1046_v54, %v1050_v57 }
 0x6df   : > { %v1052_v59 = vmul.f32 %v1051_v58, %v1051_v58 }
 0x6e1   : > { %v1053_v60 = vsel %vm507_vm0, %v1052_v59, 0.0 }
 0x6e2   : > { %1054 = vadd.xlane.f32.xlu0 %v1053_v60 }
 0x6e3   : > { %1502 = shalt.err (!%p1499_p9)
}
 0x6e4   : > { %s1605_s28 = smov 128   ;;  %s2045_s17 = smov 8   ;;  %v1391_v7 = vld [vmem:[%s2022_s10 + $0x4] ss:$0 sm:$0xff]  ;;  %v1392_v10 = vld [vmem:[%s2022_s10 + $0x5] ss:$0 sm:$0xff] }
 0x6e5   : > { %1303 = dma.vmem_to_hbm [thread:$0]  (%p1711_p4), %s1109_s27, 512, %s1111_s14, %s1080_s25, %s1605_s28, %s1605_s28, %s2045_s17  }
 0x6e6   : > { %s1263_s0 = sshll.u32 %s1829_s19, 3  ;;  %s1288_s1 = sshll.u32 %s1585_s24, 3 }
 0x6e7   : > { %s1091_s30 = scalar_lea.hbm %s2023_s11, %s1288_s1  ;;  %s475_s24 = scalar_lea.vmem [#allocation9], %s1263_s0 }
 0x6e8   : > { %s1093_s25 = sshll.u32 %s475_s24, 4  ;;  %s1095_s23 = sshll.u32 %s1091_s30, 4  ;;  %s1094_s25 = int_to_ptr.vmem [resolvable:$true] %s1093_s25  ;;  %s1096_s23 = int_to_ptr.hbm [resolvable:$true] %s1095_s23 }
 0x6e9   : > { %s1075_s29 = scalar_lea.sflag [#allocation6], %s1829_s19  ;;  %s1517_s16 = sshra.s32 %s1096_s23, 4  ;;  %s1518_s16 = int_to_ptr.hbm [resolvable:$true] %s1517_s16 }
 0x6ea   : > { %s1519_s28 = scalar_lea.hbm %s1518_s16, 8  ;;  %s1523_s0 = scalar_lea.hbm %s2023_s11, 16 }
 0x6eb   : > { %p1520_p10 = scmp.ne.s32.totalorder %s1518_s16, %s1519_s28  ;;  %p1524_p13 = scmp.lt.s32.totalorder %s1518_s16, %s2023_s11 }
 0x6ec   : > { %p1525_p0 = scmp.lt.s32.totalorder %s1523_s0, %s1519_s28 }
 0x6ed   : > { %p1521_p11 = pnand %p1520_p10, %p1711_p4 }
 0x6ee   : > { %p1526_p1 = por %p1525_p0, %p1524_p13 }
 0x6ef   : > { %p1522_p12 = pneg %p1521_p11 }
 0x6f1   : > { %p1527_p2 = pnand %p1526_p1, %p1522_p12 }
 0x755   : > { %v1055_v61 = vpop.xlane.xlu0 %1054 }
 0x756   : > { %v1056_v62 = vmul.f32 %v1055_v61, %v1871_v6 }
 0x758   : > { %v1057_v63 = vadd.f32 1e-05, %v1056_v62 }
 0x75a   : > { %1413 = vrsqrt.f32 %v1057_v63  ;;  %vm1064_vm10 = vweird.f32 %v1057_v63 }
 0x760   : > { %v1414_v0 = vpop.eup %1413 }
 0x761   : > { %v1059_v1 = vmul.f32 %v1414_v0, %v1057_v63  ;;  %vm1065_vm9 = vweird.f32 %v1414_v0 }
 0x762   : > { %vm1066_vm11 = vmor %vm1064_vm10, %vm1065_vm9 }
 0x763   : > { %v1060_v2 = vmul.f32 %v1414_v0, %v1059_v1 }
 0x765   : > { %v1061_v3 = vmul.f32 0.5, %v1060_v2 }
 0x767   : > { %v1062_v4 = vsub.f32 1.5, %v1061_v3 }
 0x769   : > { %v1063_v5 = vmul.f32 %v1414_v0, %v1062_v4 }
 0x76b   : > { %v1067_v6 = vsel %vm1066_vm11, %v1414_v0, %v1063_v5 }
 0x76c   : > { %v1068_v8 = vmul.f32 %v1067_v6, %v1051_v58 }
 0x76e   : > { %v1070_v11 = vmul.f32 %v1391_v7, %v1068_v8 }
 0x770   : > { %v1072_v9 = vadd.f32 %v1392_v10, %v1070_v11 }
 0x772   : > { %1073 = vst.msk [vmem:[%s475_s24] sm:$0xff] %vm507_vm0, %v1072_v9 }
 0x773   : > { %1530 = shalt.err (!%p1527_p2)
}
 0x774   : > { %1302 = dma.vmem_to_hbm [thread:$0]  (%p1711_p4), %s1094_s25, 128, %s1096_s23, %s1075_s29  }
 0x775 PF: > { %p1324_p3 = scmp.ge.s32.totalorder %s1593_s26, 2  ;;  %s1125_s19 = sand.u32 1, %s1573_s21  }
 0x776   : > { %s1126_s20 = scalar_lea.sflag [#allocation6], %s1125_s19 }
 0x777   : > { %p1314_p5 = pnand %p1324_p3, %p1718_p8 }
 0x779   : > { %p1315_p6 = pneg %p1314_p5 }
 0x77b   : > { %1564 = dma.done.wait (%p1315_p6), %s1126_s20, 128  }
 0x77c   : > { %1566 = vsyncadd (%p1315_p6), %s1126_s20, 4294967168  ;;  %s1136_s5 = scalar_lea.sflag [#allocation11], %s1125_s19 }
 0x77d   : > { %1568 = dma.done.wait (%p1315_p6), %s1136_s5, 512  }
 0x77e   : > { %1570 = vsyncadd (%p1315_p6), %s1136_s5, 4294966784  ;;  %s31_s26 = sadd.s32 1, %s1593_s26   ;;  %s2046_s13 = sld [smem:[#allocation16_spill]] }
 0x77f   : > { %p28_p7 = scmp.ge.s32.totalorder %s31_s26, 4   ;;  %s2047_s23 = sld [smem:[#allocation19_spill]] }
 0x780   : > { %s2048_s24 = sld [smem:[#allocation17_spill]]  ;;  %s2050_s21 = smov %s1577_s22 }
 0x781   : > { %s2049_s25 = sld [smem:[#allocation18_spill]]  ;;  %30 = sbr.rel (!%p28_p7) target bundleno = 13 (0xd), region = 135 }
 0x784   : > { %s2051_s22 = smov %s2046_s13 }
 0x786   :  { %1142 = vsyncpa [#allocation5], 1 }
 0x787   :  { %1144 = vsyncpa [#allocation5 + $0x1], 1 }
 0x788   :  { %1145 = vsyncpa [#allocation8], 1 }
 0x789   :  { %1146 = vsyncpa [#allocation6], 1 }
 0x78a   :  { %1148 = vsyncpa [#allocation6 + $0x1], 1 }
 0x78b   :  { %1149 = vsyncpa [#allocation11], 1 }
 0x78c   :  { %1151 = vsyncpa [#allocation11 + $0x1], 1 }

// kernel: tpu_custom_call.1
= control target key start
LH: loop header
LB: loop body
LE: loop exit
PB: predicated region body
PF: predicated region fallthrough
CT: control target
= control target key end

     0   :  { %s2012_s0 = inlined_call_operand.vmem [shape: f32[2,8,32], index: 0, kind: input, shape index: {}]   ;;  %s2013_s1 = inlined_call_operand.vmem [shape: f32[2,8,32], index: 1, kind: input, shape index: {}]   ;;  %s2014_s2 = inlined_call_operand.vmem [shape: f32[32,32], index: 2, kind: input, shape index: {}]   ;;  %s2015_s3 = inlined_call_operand.vmem [shape: f32[1,32], index: 3, kind: input, shape index: {}]   ;;  %s2016_s4 = inlined_call_operand.vmem [shape: f32[32,64], index: 4, kind: input, shape index: {}]   ;;  %s2017_s5 = inlined_call_operand.hbm [shape: f32[1,64], index: 5, kind: input, shape index: {}]   ;;  %s2018_s6 = inlined_call_operand.vmem [shape: f32[32,32], index: 6, kind: input, shape index: {}]   ;;  %s2019_s7 = inlined_call_operand.vmem [shape: f32[32,128], index: 7, kind: input, shape index: {}]   ;;  %s2020_s8 = inlined_call_operand.hbm [shape: f32[1,128], index: 8, kind: input, shape index: {}]   ;;  %s2021_s9 = inlined_call_operand.vmem [shape: f32[128,32], index: 9, kind: input, shape index: {}]   ;;  %s2022_s10 = inlined_call_operand.vmem [shape: f32[6,32], index: 10, kind: input, shape index: {}]   ;;  %s2023_s11 = inlined_call_operand.hbm [shape: f32[2,8,32], index: 11, kind: output, shape index: {0}]   ;;  %s2024_s12 = inlined_call_operand.hbm [shape: f32[2,4,8,8], index: 12, kind: output, shape index: {1}]  }
   0x1   :  { %2029 = sst [smem:[#allocation20_spill]] %s2012_s0 }
   0x2   :  { %2030 = sst [smem:[#allocation21_spill]] %s2013_s1 }
   0x3   :  { %2031 = sst [smem:[#allocation22_spill]] %s2014_s2 }
   0x4   :  { %2032 = sst [smem:[#allocation23_spill]] %s2017_s5 }
   0x5   :  { %18 = vsyncpa [#allocation5], 0 }
   0x6   :  { %19 = vsyncpa [#allocation8], 0 }
   0x7   :  { %20 = vsyncpa [#allocation6], 0 }
   0x8   :  { %22 = vsyncpa [#allocation6 + $0x1], 0 }
   0x9   :  { %23 = vsyncpa [#allocation11], 0 }
   0xa   :  { %25 = vsyncpa [#allocation11 + $0x1], 0  ;;  %s1671_s21 = smov 0   ;;  %s1673_s22 = smov 0  }
   0xb   :  { %s1675_s23 = smov 0   ;;  %s1677_s24 = smov 0  }
   0xc   :  { %s1679_s25 = smov 0   ;;  %s1681_s26 = smov 0  }
   0xd LB: > { %2033 = sst [smem:[#allocation16_spill]] %s1581_s23  ;;  %s1254_s27 = sadd.s32 4294967295, %s1593_s26   ;;  %s1593_s26 = sphi %s1681_s26, %s31_s26   ;;  %s1589_s25 = sphi %s1679_s25, %s2049_s25   ;;  %s1585_s24 = sphi %s1677_s24, %s2048_s24   ;;  %s1581_s23 = sphi %s1675_s23, %s2047_s23   ;;  %s1577_s22 = sphi %s1673_s22, %s2051_s22   ;;  %s1573_s21 = sphi %s1671_s21, %s2050_s21  }
   0xe   : > { %2034 = sst [smem:[#allocation17_spill]] %s1589_s25  ;;  %s1255_s28 = sadd.s32 4294967294, %s1593_s26  }
   0xf   : > { %s43_s29 = sadd.s32 1, %s1589_s25  ;;  %s295_s30 = sadd.s32 1, %s1581_s23 }
  0x10   : > { %p45_p0 = scmp.ge.s32.totalorder %s43_s29, 2  ;;  %p305_p1 = scmp.ne.s32.totalorder %s1581_s23, %s1577_s22 }
  0x11   : > { %p306_p2 = scmp.eq.s32.totalorder %s1254_s27, 1  ;;  %p311_p3 = scmp.ne.s32.totalorder %s1577_s22, %s1573_s21 }
  0x12   : > { %s2053_s29 = smov (%p45_p0, %s43_s29), 0  ;;  %p312_p5 = scmp.eq.s32.totalorder %s1255_s28, 1 }
  0x13   : > { %2035 = sst [smem:[#allocation18_spill]] %s2053_s29  ;;  %p1711_p4 = por %p306_p2, %p305_p1 }
  0x14   : > { %s290_s14 = ssub.s32 %s1589_s25, %s2053_s29  ;;  %p1256_p6 = scmp.ge.s32.totalorder %s1593_s26, 1 }
  0x15   : > { %p293_p7 = scmp.eq.s32.totalorder %s290_s14, 0  ;;  %p1718_p8 = por %p312_p5, %p311_p3 }
  0x16   : > { %p347_p9 = scmp.lt.s32.totalorder %s1593_s26, 3  ;;  %p1730_p11 = scmp.eq.s32.totalorder %s1254_s27, 0 }
  0x17   : > { %s1724_s16 = scalar_select %p293_p7, %s1581_s23, %s295_s30  }
  0x18   : > { %p1726_p10 = pnand %p1256_p6, %p347_p9  ;;  %s2041_s5 = sld [smem:[#allocation23_spill]] }
  0x19   : > { %2038 = sst [smem:[#allocation19_spill]] %s1724_s16  ;;  %s1595_s14 = smov [#allocation4]  }
  0x1a   : > { %p1306_p12 = pneg %p1726_p10  ;;  %s370_s30 = sshll.u32 %s1595_s14, 4  ;;  %s371_s30 = int_to_ptr.vmem [resolvable:$true] %s370_s30 }
  0x1b   : > { %s386_s16 = sshll.u32 %s2020_s8, 4  ;;  %s1596_s27 = smov [#allocation7]   ;;  %s387_s16 = int_to_ptr.hbm [resolvable:$true] %s386_s16 }
  0x1c   : > { %p1307_p13 = pnand %p1730_p11, %p1306_p12  ;;  %s388_s23 = sshll.u32 %s1596_s27, 4  ;;  %s389_s23 = int_to_ptr.vmem [resolvable:$true] %s388_s23 }
  0x1d   : > { %424 = sbr.rel (%p1726_p10) target bundleno = 1909 (0x775), region = 64 }
  0x1e   : > { %s368_s28 = sshll.u32 %s2041_s5, 4  ;;  %s369_s28 = int_to_ptr.hbm [resolvable:$true] %s368_s28 }
  0x1f   : > { %1309 = dma.hbm_to_vmem [thread:$0]  (!%p1307_p13), %s369_s28, 16, %s371_s30, [#allocation5]  }
  0x20   : > { %1312 = dma.hbm_to_vmem [thread:$0]  (!%p1307_p13), %s387_s16, 16, %s389_s23, [#allocation8]  }
  0x22   : > { %1556 = dma.done.wait (%p1730_p11), [#allocation5], 16  }
  0x23   : > { %1558 = vsyncadd (%p1730_p11), [#allocation5], 4294967280 }
  0x24   : > { %1560 = dma.done.wait (%p1730_p11), [#allocation8], 16  }
  0x25   : > { %1562 = vsyncadd (%p1730_p11), [#allocation8], 4294967280  ;;  %p483_p0 = scmp.lt.s32.totalorder %s1585_s24, 1  ;;  %v502_v0 = vld [vmem:[%s2016_s4 + $0x18] sm:$0xff]  ;;  %v501_v1 = vld [vmem:[%s2016_s4 + $0x10] sm:$0xff]  ;;  %s2042_s1 = sld [smem:[#allocation21_spill]] }
  0x26   : > { %523 = vmatpush.msra.mxu0 %v502_v0  ;;  %s2043_s2 = sld [smem:[#allocation22_spill]]  ;;  %v500_v3 = vld [vmem:[%s2016_s4 + $0x8] sm:$0xff]  ;;  %v499_v4 = vld [vmem:[%s2016_s4] sm:$0xff]  ;;  %vm507_vm0 = vcmask 261120   ;;  %v1384_v10 = vld [vmem:[#allocation4] ss:$0 sm:$0xff] }
  0x27   : > { %s484_s25 = scalar_select %p483_p0, %s1585_s24, 1  ;;  %v1385_v13 = vld [vmem:[%s2015_s3] ss:$0 sm:$0xff]  ;;  %vm572_vm1 = vcmask 64512  }
  0x28   : > { %524 = vmatpush.msra.mxu0 %v501_v1  ;;  %s2044_s0 = sld [smem:[#allocation20_spill]]  ;;  %s1598_s29 = smov 112  }
  0x29   : > { %s1265_s23 = sshll.u32 %s484_s25, 3  ;;  %s1599_s16 = smov 120  }
  0x2a   : > { %525 = vmatpush.msra.mxu0 %v500_v3  ;;  %s1600_s17 = smov 96   ;;  %s1829_s19 = sand.u32 1, %s1577_s22  }
  0x2b   : > { %s493_s14 = scalar_lea.vmem %s2042_s1, %s1265_s23  ;;  %s1264_s20 = sshll.u32 %s1829_s19, 5 }
  0x2c   : > { %v541_v2 = vld [vmem:[%s2043_s2 + $0x18] sm:$0xff]  ;;  %v540_v5 = vld [vmem:[%s2043_s2 + $0x10] sm:$0xff]  ;;  %v498_v6 = vld [vmem:[%s493_s14] sm:$0xff]  ;;  %526 = vmatpush.msra.mxu0 %v499_v4  ;;  %s1833_s28 = scalar_lea.vmem [#allocation10], %s1264_s20  ;;  %s2028_s18 = smov 8  }
  0x2d   : > { %562 = vmatpush.msra.mxu1 %v541_v2  ;;  %v539_v7 = vld [vmem:[%s2043_s2 + $0x8] sm:$0xff]  ;;  %v538_v8 = vld [vmem:[%s2043_s2] sm:$0xff]  ;;  %1267 = vmatmul.msk.f32.vlgmr.msra.gmra.mxu0 %vm507_vm0, %v498_v6  ;;  %s1602_s5 = smov 16   ;;  %s1603_s30 = smov 24  }
  0x2e   : > { %s489_s27 = scalar_lea.vmem %s2044_s0, %s1265_s23  ;;  %s1597_s23 = smov 104  }
  0x2f   : > { %563 = vmatpush.msra.mxu1 %v540_v5  ;;  %v1786_v9 = vld [vmem:[%s489_s27] sm:$0xff]  ;;  %s1108_s27 = sshll.u32 %s1833_s28, 4  ;;  %s1080_s25 = scalar_lea.sflag [#allocation11], %s1829_s19  ;;  %s1109_s27 = int_to_ptr.vmem [resolvable:$true] %s1108_s27 }
  0x30   : > { %s1495_s0 = scalar_lea.hbm %s2024_s12, 64 }
  0x31   : > { %564 = vmatpush.msra.mxu1 %v539_v7 }
  0x33   : > { %565 = vmatpush.msra.mxu1 %v538_v8 }
  0x34   : > { %1268 = vmatmul.msk.f32.vlgmr.msra.gmra.mxu1 %vm507_vm0, %v1786_v9 }
  0xaa   : > { %v528_v11 = vpop.f32.mrf.mxu0 }
  0xab   : > { %v529_v12 = vadd.f32 %v1384_v10, %v528_v11 }
  0xad   : > { %531 = vst.msk [vmem:[#allocation2] sm:$0xff] %vm507_vm0, %v529_v12 }
  0xb1   : > { %v567_v14 = vpop.f32.mrf.mxu1 }
  0xb2   : > { %v568_v16 = vadd.f32 %v1385_v13, %v567_v14 }
  0xb4   : > { %v570_v15 = vld [vmem:[#allocation2] sm:$0xff] }
  0xb5   : > { %813 = vrot.lane.b32.xlu2 %v570_v15, %s1597_s23  ;;  %732 = vrot.lane.b32.xlu1 %v570_v15, %s1598_s29 }
  0xb6   : > { %650 = vrot.lane.b32.xlu0 %v570_v15, %s1599_s16  ;;  %1269 = vmatpush.xpose.msk.msra.mxu2 %vm572_vm1, %v570_v15 }
  0xb9   : > { %1270 = vmatmul.msk.f32.vlgmr.msra.gmra.mxu2 %vm572_vm1, %v568_v16 }
  0xbd   : > { %811 = vrot.lane.b32.xlu2 %v568_v16, %s1597_s23  ;;  %730 = vrot.lane.b32.xlu1 %v568_v16, %s1598_s29 }
  0xbe   : > { %648 = vrot.lane.b32.xlu0 %v568_v16, %s1599_s16 }
 0x10f   : > { %v814_v18 = vpop.permute.xlu2 %813 }
 0x117   : > { %v812_v22 = vpop.permute.xlu2 %811 }
 0x127   : > { %v733_v17 = vpop.permute.xlu1 %732 }
 0x128   : > { %v651_v19 = vpop.permute.xlu0 %650  ;;  %1276 = vmatpush.xpose.msk.msrb.mxu0 %vm572_vm1, %v733_v17 }
 0x129   : > { %1272 = vmatpush.xpose.msk.msrb.mxu2 %vm572_vm1, %v651_v19 }
 0x12c   : > { %1280 = vmatpush.xpose.msk.msra.mxu0 %vm572_vm1, %v814_v18 }
 0x12f   : > { %v731_v20 = vpop.permute.xlu1 %730 }
 0x130   : > { %v649_v21 = vpop.permute.xlu0 %648  ;;  %1277 = vmatmul.msk.f32.vlgmr.msrb.gmra.mxu0 %vm572_vm1, %v731_v20 }
 0x131   : > { %1273 = vmatmul.msk.f32.vlgmr.msrb.gmra.mxu2 %vm572_vm1, %v649_v21 }
 0x138   : > { %1281 = vmatmul.msk.f32.vlgmr.msra.gmra.mxu0 %vm572_vm1, %v812_v22 }
 0x13c   : > { %v596_v23 = vpop.f32.mrf.mxu2 }
 0x13d   : > { %v599_v24 = vmul.f32 0.35355338, %v596_v23 }
 0x13f   : > { %v600_v25 = vsel %vm572_vm1, %v599_v24, -inf }
 0x140   : > { %601 = vmax.xlane.f32.xlu1 %v600_v25 }
 0x1ad   : > { %v755_v26 = vpop.f32.mrf.mxu0 }
 0x1ae   : > { %v758_v36 = vmul.f32 0.35355338, %v755_v26 }
 0x1b0   : > { %v759_v37 = vsel %vm572_vm1, %v758_v36, -inf }
 0x1b3   : > { %v602_v27 = vpop.xlane.xlu1 %601 }
 0x1b4   : > { %v673_v28 = vpop.f32.mrf.mxu2  ;;  %v603_v32 = vsub.f32 %v599_v24, %v602_v27 }
 0x1b5   : > { %v676_v29 = vmul.f32 0.35355338, %v673_v28  ;;  %v836_v30 = vpop.f32.mrf.mxu0 }
 0x1b6   : > { %v839_v31 = vmul.f32 0.35355338, %v836_v30  ;;  %v604_v35 = vmul.f32 1.442695, %v603_v32 }
 0x1b7   : > { %v677_v33 = vsel %vm572_vm1, %v676_v29, -inf }
 0x1b8   : > { %678 = vmax.xlane.f32.xlu0 %v677_v33  ;;  %v840_v34 = vsel %vm572_vm1, %v839_v31, -inf  ;;  %1393 = vpow2.f32 %v604_v35 }
 0x1b9   : > { %841 = vmax.xlane.f32.xlu2 %v840_v34 }
 0x1be   : > { %v1394_v38 = vpop.eup %1393 }
 0x1bf   : > { %v606_v39 = vsel %vm572_vm1, %v1394_v38, 0.0 }
 0x1c1   : > { %760 = vmax.xlane.f32.xlu2 %v759_v37 }
 0x1c9   : > { %607 = vadd.xlane.f32.xlu2 %v606_v39 }
 0x1cc   : > { %533 = vrot.lane.b32.xlu0 %v529_v12, %s1600_s17  ;;  %s1293_s17 = sshll.u32 %s1585_s24, 5 }
 0x22b   : > { %v679_v40 = vpop.xlane.xlu0 %678 }
 0x22c   : > { %v680_v41 = vsub.f32 %v676_v29, %v679_v40  ;;  %v842_v42 = vpop.xlane.xlu2 %841 }
 0x22d   : > { %v843_v44 = vsub.f32 %v839_v31, %v842_v42 }
 0x22e   : > { %v681_v43 = vmul.f32 1.442695, %v680_v41 }
 0x22f   : > { %v844_v45 = vmul.f32 1.442695, %v843_v44 }
 0x230   : > { %1395 = vpow2.f32 %v681_v43 }
 0x231   : > { %1397 = vpow2.f32 %v844_v45 }
 0x234   : > { %v761_v46 = vpop.xlane.xlu2 %760 }
 0x235   : > { %v762_v47 = vsub.f32 %v758_v36, %v761_v46 }
 0x236   : > { %v1814_v48 = vpop.eup %1395 }
 0x237   : > { %v763_v49 = vmul.f32 1.442695, %v762_v47  ;;  %v683_v50 = vsel %vm572_vm1, %v1814_v48, 0.0  ;;  %v1818_v51 = vpop.eup %1397 }
 0x238   : > { %684 = vadd.xlane.f32.xlu1 %v683_v50  ;;  %v846_v55 = vsel %vm572_vm1, %v1818_v51, 0.0  ;;  %v917_v50 = vld [vmem:[%s2018_s6 + $0x10] sm:$0xff] }
 0x239   : > { %1399 = vpow2.f32 %v763_v49  ;;  %v918_v49 = vld [vmem:[%s2018_s6 + $0x18] sm:$0xff] }
 0x23a   : > { %935 = vmatpush.msrb.mxu0 %v918_v49 }
 0x23c   : > { %v608_v52 = vpop.xlane.xlu2 %607  ;;  %936 = vmatpush.msrb.mxu0 %v917_v50 }
 0x23d   : > { %1401 = vrcp.f32 %v608_v52  ;;  %v620_v61 = vand.u32 2147483648, %v608_v52  ;;  %v618_v63 = vand.u32 2147483647, %v608_v52  ;;  %vm614_vm3 = vweird.f32 %v608_v52 }
 0x23e   : > { %v534_v53 = vpop.permute.xlu0 %533 }
 0x23f   : > { %v1820_v54 = vpop.eup %1399  ;;  %536 = vst.msk [vmem:[#allocation3] sm:$0xff] %vm507_vm0, %v534_v53  ;;  %v621_v1 = vor.u32 1.1754944e-38, %v620_v61  ;;  %vm619_vm5 = vcmp.eq.f32.partialorder %v618_v63, 8.507059e+37 }
 0x240   : > { %847 = vadd.xlane.f32.xlu1 %v846_v55  ;;  %v765_v56 = vsel %vm572_vm1, %v1820_v54, 0.0 }
 0x241   : > { %766 = vadd.xlane.f32.xlu2 %v765_v56 }
 0x243   : > { %v1402_v57 = vpop.eup %1401 }
 0x244   : > { %v610_v58 = vmul.f32 %v1402_v57, %v608_v52  ;;  %vm615_vm2 = vweird.f32 %v1402_v57  ;;  %v915_v52 = vld [vmem:[%s2018_s6] sm:$0xff] }
 0x245   : > { %vm616_vm4 = vmor %vm614_vm3, %vm615_vm2 }
 0x246   : > { %v611_v59 = vsub.f32 1.0, %v610_v58  ;;  %v571_v60 = vld [vmem:[#allocation3] sm:$0xff] }
 0x247   : > { %866 = vrot.lane.b32.xlu0 %v571_v60, %s1597_s23  ;;  %643 = vmatpush.msrb.mxu1 %v571_v60 }
 0x248   : > { %v612_v62 = vmul.f32 %v1402_v57, %v611_v59  ;;  %v1386_v59 = vld [vmem:[%s2022_s10] ss:$0 sm:$0xff] }
 0x24a   : > { %v613_v0 = vadd.f32 %v1402_v57, %v612_v62 }
 0x24c   : > { %v617_v2 = vsel %vm616_vm4, %v1402_v57, %v613_v0  ;;  %vm905_vm4 = vcmask 130048   ;;  %v1604_v0 = vmov 32.0  }
 0x24d   : > { %v622_v3 = vsel %vm619_vm5, %v621_v1, %v617_v2  ;;  %vm907_vm5 = vcmask 195584  }
 0x24e   : > { %v623_v4 = vmul.f32 %v1394_v38, %v622_v3 }
 0x250   : > { %1271 = vmatmul.msk.f32.vlgmr.msrb.gmra.mxu1 %vm572_vm1, %v623_v4  ;;  %624 = vst.msk [vmem:[%s1833_s28] sm:$0xff] %vm572_vm1, %v623_v4 }
 0x259   : > { %704 = vrot.lane.b32.xlu1 %v571_v60, %s1599_s16  ;;  %785 = vrot.lane.b32.xlu2 %v571_v60, %s1598_s29 }
 0x2ab   : > { %v685_v5 = vpop.xlane.xlu1 %684 }
 0x2ac   : > { %1403 = vrcp.f32 %v685_v5  ;;  %v697_v12 = vand.u32 2147483648, %v685_v5  ;;  %v695_v14 = vand.u32 2147483647, %v685_v5  ;;  %vm691_vm7 = vweird.f32 %v685_v5 }
 0x2ae   : > { %v698_v17 = vor.u32 1.1754944e-38, %v697_v12  ;;  %vm696_vm9 = vcmp.eq.f32.partialorder %v695_v14, 8.507059e+37  ;;  %v980_v12 = vld [vmem:[%s2019_s7 + $0x18] sm:$0xff]  ;;  %v978_v14 = vld [vmem:[%s2019_s7 + $0x8] sm:$0xff] }
 0x2b2   : > { %v1404_v6 = vpop.eup %1403 }
 0x2b3   : > { %v687_v7 = vmul.f32 %v1404_v6, %v685_v5  ;;  %v848_v8 = vpop.xlane.xlu1 %847  ;;  %vm692_vm6 = vweird.f32 %v1404_v6 }
 0x2b4   : > { %1405 = vrcp.f32 %v848_v8  ;;  %v767_v10 = vpop.xlane.xlu2 %766  ;;  %vm693_vm8 = vmor %vm691_vm7, %vm692_vm6  ;;  %v860_v26 = vand.u32 2147483648, %v848_v8  ;;  %v858_v29 = vand.u32 2147483647, %v848_v8  ;;  %vm854_vm12 = vweird.f32 %v848_v8 }
 0x2b5   : > { %v688_v11 = vsub.f32 1.0, %v687_v7  ;;  %1407 = vrcp.f32 %v767_v10  ;;  %v779_v30 = vand.u32 2147483648, %v767_v10  ;;  %v777_v32 = vand.u32 2147483647, %v767_v10 }
 0x2b6   : > { %v861_v34 = vor.u32 1.1754944e-38, %v860_v26  ;;  %vm773_vm14 = vweird.f32 %v767_v10  ;;  %vm859_vm15 = vcmp.eq.f32.partialorder %v858_v29, 8.507059e+37  ;;  %1409 = vrcp.f32 %v1604_v0  ;;  %v1017_v26 = vld [vmem:[%s2021_s9 + $0x40] sm:$0xff] }
 0x2b7   : > { %v689_v13 = vmul.f32 %v1404_v6, %v688_v11  ;;  %v780_v37 = vor.u32 1.1754944e-38, %v779_v30  ;;  %vm778_vm3 = vcmp.eq.f32.partialorder %v777_v32, 8.507059e+37  ;;  %v1015_v30 = vld [vmem:[%s2021_s9 + $0x30] sm:$0xff]  ;;  %v1014_v32 = vld [vmem:[%s2021_s9 + $0x28] sm:$0xff] }
 0x2b9   : > { %v690_v15 = vadd.f32 %v1404_v6, %v689_v13  ;;  %v867_v44 = vpop.permute.xlu0 %866  ;;  %v979_v13 = vld [vmem:[%s2019_s7 + $0x10] sm:$0xff] }
 0x2ba   : > { %v1406_v16 = vpop.eup %1405 }
 0x2bb   : > { %v1408_v18 = vpop.eup %1407  ;;  %v694_v19 = vsel %vm693_vm8, %v1404_v6, %v690_v15  ;;  %v850_v20 = vmul.f32 %v1406_v16, %v848_v8  ;;  %vm855_vm10 = vweird.f32 %v1406_v16  ;;  %v977_v15 = vld [vmem:[%s2019_s7] sm:$0xff] }
 0x2bc   : > { %v699_v21 = vsel %vm696_vm9, %v698_v17, %v694_v19  ;;  %v769_v22 = vmul.f32 %v1408_v18, %v767_v10  ;;  %v786_v23 = vpop.permute.xlu2 %785  ;;  %vm774_vm11 = vweird.f32 %v1408_v18  ;;  %vm856_vm13 = vmor %vm854_vm12, %vm855_vm10  ;;  %v1410_v1 = vpop.eup %1409  ;;  %v1023_v17 = vld [vmem:[%s2021_s9 + $0x70] sm:$0xff] }
 0x2bd   : > { %v851_v24 = vsub.f32 1.0, %v850_v20  ;;  %806 = vmatpush.msra.mxu1 %v786_v23  ;;  %v700_v25 = vmul.f32 %v1814_v48, %v699_v21  ;;  %vm775_vm2 = vmor %vm773_vm14, %vm774_vm11  ;;  %v948_v2 = vmul.f32 32.0, %v1410_v1  ;;  %v1021_v21 = vld [vmem:[%s2021_s9 + $0x60] sm:$0xff]  ;;  %v1020_v23 = vld [vmem:[%s2021_s9 + $0x58] sm:$0xff] }
 0x2be   : > { %v770_v27 = vsub.f32 1.0, %v769_v22 }
 0x2bf   : > { %v852_v28 = vmul.f32 %v1406_v16, %v851_v24  ;;  %1274 = vst.msk [vmem:[%s1833_s28 + $0x8] sm:$0xff] %vm572_vm1, %v700_v25  ;;  %v949_v3 = vsub.f32 1.0, %v948_v2  ;;  %1000 = vmatpush.msrb.mxu1 %v980_v12  ;;  %v1019_v24 = vld [vmem:[%s2021_s9 + $0x50] sm:$0xff] }
 0x2c0   : > { %v771_v31 = vmul.f32 %v1408_v18, %v770_v27 }
 0x2c1   : > { %v853_v33 = vadd.f32 %v1406_v16, %v852_v28  ;;  %v950_v4 = vmul.f32 %v1410_v1, %v949_v3  ;;  %1001 = vmatpush.msrb.mxu1 %v979_v13  ;;  %v1016_v28 = vld [vmem:[%s2021_s9 + $0x38] sm:$0xff] }
 0x2c2   : > { %v772_v35 = vadd.f32 %v1408_v18, %v771_v31 }
 0x2c3   : > { %v857_v36 = vsel %vm856_vm13, %v1406_v16, %v853_v33  ;;  %v951_v5 = vadd.f32 %v1410_v1, %v950_v4  ;;  %1002 = vmatpush.msrb.mxu1 %v978_v14  ;;  %v1024_v16 = vld [vmem:[%s2021_s9 + $0x78] sm:$0xff] }
 0x2c4   : > { %v862_v38 = vsel %vm859_vm15, %v861_v34, %v857_v36  ;;  %v776_v39 = vsel %vm775_vm2, %v1408_v18, %v772_v35  ;;  %1026 = vmatpush.msra.mxu3 %v1024_v16  ;;  %v1022_v18 = vld [vmem:[%s2021_s9 + $0x68] sm:$0xff]  ;;  %v1013_v34 = vld [vmem:[%s2021_s9 + $0x20] sm:$0xff]  ;;  %v1012_v36 = vld [vmem:[%s2021_s9 + $0x18] sm:$0xff] }
 0x2c5   : > { %v781_v40 = vsel %vm778_vm3, %v780_v37, %v776_v39  ;;  %v863_v41 = vmul.f32 %v1818_v51, %v862_v38  ;;  %v916_v51 = vld [vmem:[%s2018_s6 + $0x8] sm:$0xff]  ;;  %1003 = vmatpush.msrb.mxu1 %v977_v15  ;;  %v1387_v38 = vld [vmem:[%s2022_s10 + $0x1] ss:$0 sm:$0xff] }
 0x2c6   : > { %v782_v42 = vmul.f32 %v1820_v54, %v781_v40  ;;  %937 = vmatpush.msrb.mxu0 %v916_v51  ;;  %1027 = vmatpush.msra.mxu3 %v1023_v17  ;;  %v1390_v51 = vld [vmem:[%s2022_s10 + $0x3] ss:$0 sm:$0xff] }
 0x2c7   : > { %1282 = vst.msk [vmem:[%s1833_s28 + $0x18] sm:$0xff] %vm572_vm1, %v863_v41 }
 0x2c8   : > { %1279 = vmatmul.msk.f32.vlgmr.msra.gmra.mxu1 %vm572_vm1, %v782_v42  ;;  %1278 = vst.msk [vmem:[%s1833_s28 + $0x10] sm:$0xff] %vm572_vm1, %v782_v42  ;;  %938 = vmatpush.msrb.mxu0 %v915_v52 }
 0x2c9   : > { %1028 = vmatpush.msra.mxu3 %v1022_v18 }
 0x2cb   : > { %v705_v43 = vpop.permute.xlu1 %704  ;;  %1029 = vmatpush.msra.mxu3 %v1021_v21 }
 0x2cc   : > { %725 = vmatpush.msra.mxu2 %v705_v43 }
 0x2cd   : > { %1275 = vmatmul.msk.f32.vlgmr.msra.gmra.mxu2 %vm572_vm1, %v700_v25  ;;  %v645_v45 = vpop.f32.mrf.mxu1  ;;  %1030 = vmatpush.msra.mxu3 %v1020_v23  ;;  %v1018_v25 = vld [vmem:[%s2021_s9 + $0x48] sm:$0xff] }
 0x2ce   : > { %887 = vmatpush.msrb.mxu2 %v867_v44  ;;  %v1011_v44 = vld [vmem:[%s2021_s9 + $0x10] sm:$0xff] }
 0x2cf   : > { %1031 = vmatpush.msra.mxu3 %v1019_v24 }
 0x2d1   : > { %1032 = vmatpush.msra.mxu3 %v1018_v25 }
 0x2d3   : > { %1033 = vmatpush.msra.mxu3 %v1017_v26 }
 0x2d5   : > { %1283 = vmatmul.msk.f32.vlgmr.msrb.gmra.mxu2 %vm572_vm1, %v863_v41  ;;  %1034 = vmatpush.msra.mxu3 %v1016_v28  ;;  %v1388_v41 = vld [vmem:[%s2022_s10 + $0x2] ss:$0 sm:$0xff] }
 0x2d7   : > { %1035 = vmatpush.msra.mxu3 %v1015_v30 }
 0x2d9   : > { %1036 = vmatpush.msra.mxu3 %v1014_v32 }
 0x2db   : > { %1037 = vmatpush.msra.mxu3 %v1013_v34 }
 0x2dd   : > { %1038 = vmatpush.msra.mxu3 %v1012_v36 }
 0x2df   : > { %1039 = vmatpush.msra.mxu3 %v1011_v44 }
 0x345   : > { %v808_v47 = vpop.f32.mrf.mxu1 }
 0x350   : > { %v727_v46 = vpop.f32.mrf.mxu2 }
 0x351   : > { %893 = vrot.lane.b32.xlu0 %v727_v46, %s2028_s18  ;;  %v1009_v46 = vld [vmem:[%s2021_s9] sm:$0xff] }
 0x358   : > { %v889_v48 = vpop.f32.mrf.mxu2 }
 0x359   : > { %897 = vrot.lane.b32.xlu0 %v808_v47, %s1602_s5  ;;  %901 = vrot.lane.b32.xlu1 %v889_v48, %s1603_s30  ;;  %v1389_v47 = vld [vmem:[#allocation7] ss:$0 sm:$0xff]  ;;  %s1107_s30 = scalar_lea.hbm %s2024_s12, %s1293_s17 }
 0x35a   : > { %s1110_s14 = sshll.u32 %s1107_s30, 4  ;;  %s1111_s14 = int_to_ptr.hbm [resolvable:$true] %s1110_s14 }
 0x35b   : > { %s1489_s23 = sshra.s32 %s1111_s14, 4  ;;  %s1490_s23 = int_to_ptr.hbm [resolvable:$true] %s1489_s23 }
 0x35c   : > { %s1491_s29 = scalar_lea.hbm %s1490_s23, 32  ;;  %p1496_p5 = scmp.lt.s32.totalorder %s1490_s23, %s2024_s12 }
 0x35d   : > { %p1492_p1 = scmp.ne.s32.totalorder %s1490_s23, %s1491_s29  ;;  %p1497_p6 = scmp.lt.s32.totalorder %s1495_s0, %s1491_s29 }
 0x35f   : > { %p1493_p2 = pnand %p1492_p1, %p1711_p4  ;;  %p1498_p7 = por %p1497_p6, %p1496_p5 }
 0x361   : > { %p1494_p3 = pneg %p1493_p2 }
 0x363   : > { %p1499_p9 = pnand %p1498_p7, %p1494_p3 }
 0x3c3   : > { %v894_v53 = vpop.permute.xlu0 %893 }
 0x3c4   : > { %v904_v54 = vsel %vm572_vm1, %v645_v45, %v894_v53  ;;  %vm952_vm1 = vweird.f32 %v1410_v1  ;;  %v1010_v45 = vld [vmem:[%s2021_s9 + $0x8] sm:$0xff] }
 0x3c5   : > { %v1871_v6 = vsel %vm952_vm1, %v1410_v1, %v951_v5  ;;  %1040 = vmatpush.msra.mxu3 %v1010_v45 }
 0x3c7   : > { %1041 = vmatpush.msra.mxu3 %v1009_v46 }
 0x3cb   : > { %v898_v55 = vpop.permute.xlu0 %897  ;;  %v902_v56 = vpop.permute.xlu1 %901 }
 0x3cc   : > { %v906_v57 = vsel %vm905_vm4, %v904_v54, %v898_v55 }
 0x3cd   : > { %v908_v58 = vsel %vm907_vm5, %v906_v57, %v902_v56 }
 0x3ce   : > { %1284 = vmatmul.msk.f32.vlgmr.msrb.gmra.mxu0 %vm507_vm0, %v908_v58 }
 0x44b   : > { %v940_v60 = vpop.f32.mrf.mxu0 }
 0x44c   : > { %v941_v61 = vadd.f32 %v1386_v59, %v940_v60 }
 0x44e   : > { %v943_v62 = vadd.f32 %v941_v61, %v1786_v9 }
 0x450   : > { %v944_v63 = vsel %vm507_vm0, %v943_v62, 0.0 }
 0x451   : > { %945 = vadd.xlane.f32.xlu0 %v944_v63 }
 0x4c4   : > { %v946_v7 = vpop.xlane.xlu0 %945 }
 0x4c5   : > { %v954_v8 = vmul.f32 %v1871_v6, %v946_v7 }
 0x4c7   : > { %v955_v10 = vsub.f32 %v943_v62, %v954_v8 }
 0x4c9   : > { %v956_v11 = vmul.f32 %v955_v10, %v955_v10 }
 0x4cb   : > { %v957_v9 = vsel %vm507_vm0, %v956_v11, 0.0 }
 0x4cc   : > { %958 = vadd.xlane.f32.xlu2 %v957_v9 }
 0x53f   : > { %v959_v19 = vpop.xlane.xlu2 %958 }
 0x540   : > { %v960_v20 = vmul.f32 %v959_v19, %v1871_v6 }
 0x542   : > { %v961_v22 = vadd.f32 1e-05, %v960_v20 }
 0x544   : > { %1411 = vrsqrt.f32 %v961_v22  ;;  %vm968_vm7 = vweird.f32 %v961_v22 }
 0x54a   : > { %v1412_v27 = vpop.eup %1411 }
 0x54b   : > { %v963_v29 = vmul.f32 %v1412_v27, %v961_v22  ;;  %vm969_vm6 = vweird.f32 %v1412_v27 }
 0x54c   : > { %vm970_vm8 = vmor %vm968_vm7, %vm969_vm6 }
 0x54d   : > { %v964_v31 = vmul.f32 %v1412_v27, %v963_v29 }
 0x54f   : > { %v965_v33 = vmul.f32 0.5, %v964_v31 }
 0x551   : > { %v966_v35 = vsub.f32 1.5, %v965_v33 }
 0x553   : > { %v967_v37 = vmul.f32 %v1412_v27, %v966_v35 }
 0x555   : > { %v971_v39 = vsel %vm970_vm8, %v1412_v27, %v967_v37 }
 0x556   : > { %v972_v40 = vmul.f32 %v971_v39, %v955_v10 }
 0x558   : > { %v974_v42 = vmul.f32 %v1387_v38, %v972_v40 }
 0x55a   : > { %v976_v43 = vadd.f32 %v1388_v41, %v974_v42 }
 0x55c   : > { %1285 = vmatmul.msk.f32.vlgmr.msrb.gmra.mxu1 %vm507_vm0, %v976_v43 }
 0x5d9   : > { %v1005_v48 = vpop.f32.mrf.mxu1 }
 0x5da   : > { %v1006_v49 = vadd.f32 %v1389_v47, %v1005_v48 }
 0x5dc   : > { %v1008_v50 = vmax.f32 %v1006_v49, 0.0 }
 0x5de   : > { %1042 = vmatmul.f32.vlgmr.msra.gmra.mxu3 %v1008_v50 }
 0x661   : > { %v1043_v52 = vpop.f32.mrf.mxu3 }
 0x662   : > { %v1044_v53 = vadd.f32 %v1390_v51, %v1043_v52 }
 0x664   : > { %v1046_v54 = vadd.f32 %v1044_v53, %v976_v43 }
 0x666   : > { %v1047_v55 = vsel %vm507_vm0, %v1046_v54, 0.0 }
 0x667   : > { %1048 = vadd.xlane.f32.xlu1 %v1047_v55 }
 0x6da   : > { %v1049_v56 = vpop.xlane.xlu1 %1048 }
 0x6db   : > { %v1050_v57 = vmul.f32 %v1049_v56, %v1871_v6 }
 0x6dd   : > { %v1051_v58 = vsub.f32 %v1046_v54, %v1050_v57 }
 0x6df   : > { %v1052_v59 = vmul.f32 %v1051_v58, %v1051_v58 }
 0x6e1   : > { %v1053_v60 = vsel %vm507_vm0, %v1052_v59, 0.0 }
 0x6e2   : > { %1054 = vadd.xlane.f32.xlu0 %v1053_v60 }
 0x6e3   : > { %1502 = shalt.err (!%p1499_p9)
}
 0x6e4   : > { %s1605_s28 = smov 128   ;;  %s2045_s17 = smov 8   ;;  %v1391_v7 = vld [vmem:[%s2022_s10 + $0x4] ss:$0 sm:$0xff]  ;;  %v1392_v10 = vld [vmem:[%s2022_s10 + $0x5] ss:$0 sm:$0xff] }
 0x6e5   : > { %1303 = dma.vmem_to_hbm [thread:$0]  (%p1711_p4), %s1109_s27, 512, %s1111_s14, %s1080_s25, %s1605_s28, %s1605_s28, %s2045_s17  }
 0x6e6   : > { %s1263_s0 = sshll.u32 %s1829_s19, 3  ;;  %s1288_s1 = sshll.u32 %s1585_s24, 3 }
 0x6e7   : > { %s1091_s30 = scalar_lea.hbm %s2023_s11, %s1288_s1  ;;  %s475_s24 = scalar_lea.vmem [#allocation9], %s1263_s0 }
 0x6e8   : > { %s1093_s25 = sshll.u32 %s475_s24, 4  ;;  %s1095_s23 = sshll.u32 %s1091_s30, 4  ;;  %s1094_s25 = int_to_ptr.vmem [resolvable:$true] %s1093_s25  ;;  %s1096_s23 = int_to_ptr.hbm [resolvable:$true] %s1095_s23 }
 0x6e9   : > { %s1075_s29 = scalar_lea.sflag [#allocation6], %s1829_s19  ;;  %s1517_s16 = sshra.s32 %s1096_s23, 4  ;;  %s1518_s16 = int_to_ptr.hbm [resolvable:$true] %s1517_s16 }
 0x6ea   : > { %s1519_s28 = scalar_lea.hbm %s1518_s16, 8  ;;  %s1523_s0 = scalar_lea.hbm %s2023_s11, 16 }
 0x6eb   : > { %p1520_p10 = scmp.ne.s32.totalorder %s1518_s16, %s1519_s28  ;;  %p1524_p13 = scmp.lt.s32.totalorder %s1518_s16, %s2023_s11 }
 0x6ec   : > { %p1525_p0 = scmp.lt.s32.totalorder %s1523_s0, %s1519_s28 }
 0x6ed   : > { %p1521_p11 = pnand %p1520_p10, %p1711_p4 }
 0x6ee   : > { %p1526_p1 = por %p1525_p0, %p1524_p13 }
 0x6ef   : > { %p1522_p12 = pneg %p1521_p11 }
 0x6f1   : > { %p1527_p2 = pnand %p1526_p1, %p1522_p12 }
 0x755   : > { %v1055_v61 = vpop.xlane.xlu0 %1054 }
 0x756   : > { %v1056_v62 = vmul.f32 %v1055_v61, %v1871_v6 }
 0x758   : > { %v1057_v63 = vadd.f32 1e-05, %v1056_v62 }
 0x75a   : > { %1413 = vrsqrt.f32 %v1057_v63  ;;  %vm1064_vm10 = vweird.f32 %v1057_v63 }
 0x760   : > { %v1414_v0 = vpop.eup %1413 }
 0x761   : > { %v1059_v1 = vmul.f32 %v1414_v0, %v1057_v63  ;;  %vm1065_vm9 = vweird.f32 %v1414_v0 }
 0x762   : > { %vm1066_vm11 = vmor %vm1064_vm10, %vm1065_vm9 }
 0x763   : > { %v1060_v2 = vmul.f32 %v1414_v0, %v1059_v1 }
 0x765   : > { %v1061_v3 = vmul.f32 0.5, %v1060_v2 }
 0x767   : > { %v1062_v4 = vsub.f32 1.5, %v1061_v3 }
 0x769   : > { %v1063_v5 = vmul.f32 %v1414_v0, %v1062_v4 }
 0x76b   : > { %v1067_v6 = vsel %vm1066_vm11, %v1414_v0, %v1063_v5 }
 0x76c   : > { %v1068_v8 = vmul.f32 %v1067_v6, %v1051_v58 }
 0x76e   : > { %v1070_v11 = vmul.f32 %v1391_v7, %v1068_v8 }
 0x770   : > { %v1072_v9 = vadd.f32 %v1392_v10, %v1070_v11 }
 0x772   : > { %1073 = vst.msk [vmem:[%s475_s24] sm:$0xff] %vm507_vm0, %v1072_v9 }
 0x773   : > { %1530 = shalt.err (!%p1527_p2)
}
 0x774   : > { %1302 = dma.vmem_to_hbm [thread:$0]  (%p1711_p4), %s1094_s25, 128, %s1096_s23, %s1075_s29  }
 0x775 PF: > { %p1324_p3 = scmp.ge.s32.totalorder %s1593_s26, 2  ;;  %s1125_s19 = sand.u32 1, %s1573_s21  }
 0x776   : > { %s1126_s20 = scalar_lea.sflag [#allocation6], %s1125_s19 }
 0x777   : > { %p1314_p5 = pnand %p1324_p3, %p1718_p8 }
 0x779   : > { %p1315_p6 = pneg %p1314_p5 }
 0x77b   : > { %1564 = dma.done.wait (%p1315_p6), %s1126_s20, 128  }
 0x77c   : > { %1566 = vsyncadd (%p1315_p6), %s1126_s20, 4294967168  ;;  %s1136_s5 = scalar_lea.sflag [#allocation11], %s1125_s19 }
 0x77d   : > { %1568 = dma.done.wait (%p1315_p6), %s1136_s5, 512  }
 0x77e   : > { %1570 = vsyncadd (%p1315_p6), %s1136_s5, 4294966784  ;;  %s31_s26 = sadd.s32 1, %s1593_s26   ;;  %s2046_s13 = sld [smem:[#allocation16_spill]] }
 0x77f   : > { %p28_p7 = scmp.ge.s32.totalorder %s31_s26, 4   ;;  %s2047_s23 = sld [smem:[#allocation19_spill]] }
 0x780   : > { %s2048_s24 = sld [smem:[#allocation17_spill]]  ;;  %s2050_s21 = smov %s1577_s22 }
 0x781   : > { %s2049_s25 = sld [smem:[#allocation18_spill]]  ;;  %30 = sbr.rel (!%p28_p7) target bundleno = 13 (0xd), region = 135 }
 0x784   : > { %s2051_s22 = smov %s2046_s13 }
 0x786   :  { %1142 = vsyncpa [#allocation5], 1 }
 0x787   :  { %1144 = vsyncpa [#allocation5 + $0x1], 1 }
 0x788   :  { %1145 = vsyncpa [#allocation8], 1 }
 0x789   :  { %1146 = vsyncpa [#allocation6], 1 }
 0x78a   :  { %1148 = vsyncpa [#allocation6 + $0x1], 1 }
 0x78b   :  { %1149 = vsyncpa [#allocation11], 1 }
 0x78c   :  { %1151 = vsyncpa [#allocation11 + $0x1], 1 }

</bundles_post_ra>
